<compile_context>
chip_gen: v6e
topology: v6e:2x2x1
jax: 0.10.0
libtpu: 0.0.40
codegen_flags: <defaults>
</compile_context>

<pallas_src>
import functools

import jax
import jax.numpy as jnp
from jax import lax
from jax.experimental import pallas as pl
from jax.experimental.pallas import tpu as pltpu

KERNEL_SIZE = 5
KK = KERNEL_SIZE * KERNEL_SIZE
STRIDE = 2
PADDING = KERNEL_SIZE // 2
LEAKY_SLOPE = 0.2
BN_EPS = 1e-4                      # the module passes eps=0.0001 explicitly


def _vmem_limit_bytes():
    try:
        cap = pltpu.get_tpu_info().vmem_capacity_bytes
    except Exception:
        cap = 128 * 1024 * 1024
    return int(min(64 * 1024 * 1024, max(cap // 2, 16 * 1024 * 1024)))


VMEM_LIMIT = _vmem_limit_bytes()


def _pick_tn(cout):
    """Cout tile width: 256-granular where possible (v6e/v7x MXU), else 128, else full."""
    if cout % 256 == 0:
        return 256
    if cout % 128 == 0:
        return 128
    return cout


def _leaky(x):
    return jnp.maximum(x, LEAKY_SLOPE * x)


# ----------------------------- Pallas kernels ------------------------------

def _conv_im2col_kernel(x_ref, w_ref, b_ref, o_ref, *, apply_leaky):
    """Layer-0 conv: one (mb, K)x(K, TN) MXU matmul per (image, Cout-tile)."""
    acc = jnp.dot(x_ref[0], w_ref[...], preferred_element_type=jnp.float32)
    acc = acc + b_ref[...]
    if apply_leaky:
        acc = _leaky(acc)
    o_ref[0] = acc.astype(o_ref.dtype)


def _conv_cells_kernel(x_ref, w_ref, b_ref, o_ref, s_ref=None, *,
                       mb, owp, ow, apply_leaky, emit_stats, head_vpu):
    """Fused 5x5 / stride-2 conv for one (image, Cout-tile) grid step.

    x_ref : (1, rtot, 4*Cin) bf16   phase-interleaved padded input, rows flattened
    w_ref : (9, 4*Cin, TN)   bf16   per-cell weight slabs (zero rows for absent taps)
            (9, 1, 4*Cin) for the Cout==1 VPU head
    b_ref : (1, TN)          f32
    o_ref : (1, mb, TN)      bf16/f32
    s_ref : (1, 2, TN)       f32    masked [sum; sum_sq] per channel (BatchNorm)
    """
    tn = o_ref.shape[2]
    acc = jnp.zeros((mb, tn), jnp.float32)
    for di in range(3):
        for dj in range(3):
            off = di * owp + dj                       # static flat-row shift of the cell
            lhs = x_ref[0, pl.ds(off, mb), :]         # (mb, 4*Cin) contiguous rows
            cell = di * 3 + dj
            if head_vpu:
                # Cout == 1: VPU multiply + cross-lane reduce (don't waste 255/256
                # MXU output columns on a 1-column matmul).
                w_row = w_ref[cell].astype(jnp.float32)           # (1, 4*Cin)
                acc = acc + jnp.sum(lhs.astype(jnp.float32) * w_row,
                                    axis=-1, keepdims=True)
            else:
                acc = acc + jnp.dot(lhs, w_ref[cell],
                                    preferred_element_type=jnp.float32)
    acc = acc + b_ref[...]
    if apply_leaky:
        acc = _leaky(acc)
    o_ref[0] = acc.astype(o_ref.dtype)
    if emit_stats:
        # validity mask over the (OH, OWp) overshoot grid, generated on the VPU
        r = lax.broadcasted_iota(jnp.int32, (mb, 1), 0)
        m = ((r % owp) < ow).astype(jnp.float32)
        s_ref[0, 0:1, :] = jnp.sum(acc * m, axis=0, keepdims=True)
        s_ref[0, 1:2, :] = jnp.sum(acc * acc * m, axis=0, keepdims=True)


def _bn_leaky_apply_kernel(x_ref, a_ref, b_ref, o_ref):
    """y = a*x + b (precomputed per-channel scale/shift) fused with LeakyReLU(0.2)."""
    y = x_ref[0].astype(jnp.float32) * a_ref[...] + b_ref[...]
    o_ref[0] = _leaky(y).astype(o_ref.dtype)


# ----------------------------- wrappers ------------------------------------

def conv2d_im2col_pallas(x_nhwc, w_oihw, bias, oh, ow, *, apply_leaky, out_dtype):
    """Layer-0 conv (Cin=3): im2col to K=75 (padded to 80), single matmul per image."""
    n, h, w, cin = x_nhwc.shape
    cout = w_oihw.shape[0]
    mb = oh * ow

    xb = x_nhwc.astype(jnp.bfloat16)
    xp = jnp.pad(xb, ((0, 0), (PADDING, PADDING), (PADDING, PADDING), (0, 0)))
    cols = [xp[:, ki:ki + 2 * oh:2, kj:kj + 2 * ow:2, :]
            for ki in range(KERNEL_SIZE) for kj in range(KERNEL_SIZE)]
    patches = jnp.stack(cols, axis=3).reshape(n, mb, KK * cin)     # (N, mb, 75)

    k0 = KK * cin
    k0p = ((k0 + 7) // 8) * 8
    if k0p != k0:
        patches = jnp.pad(patches, ((0, 0), (0, 0), (0, k0p - k0)))

    wmat = jnp.transpose(w_oihw, (2, 3, 1, 0)).reshape(k0, cout).astype(jnp.bfloat16)
    if k0p != k0:
        wmat = jnp.pad(wmat, ((0, k0p - k0), (0, 0)))
    b2d = bias.reshape(1, cout).astype(jnp.float32)

    tn = _pick_tn(cout)
    nj = cout // tn
    kernel = functools.partial(_conv_im2col_kernel, apply_leaky=apply_leaky)

    return pl.pallas_call(
        kernel,
        grid=(nj, n),
        in_specs=[pl.BlockSpec((1, mb, k0p), lambda j, b: (b, 0, 0)),
                  pl.BlockSpec((k0p, tn), lambda j, b: (0, j)),
                  pl.BlockSpec((1, tn), lambda j, b: (0, j))],
        out_specs=pl.BlockSpec((1, mb, tn), lambda j, b: (b, 0, j)),
        out_shape=jax.ShapeDtypeStruct((n, mb, cout), out_dtype),
        compiler_params=pltpu.CompilerParams(
            dimension_semantics=("parallel", "parallel"),
            vmem_limit_bytes=VMEM_LIMIT),
    )(patches, wmat, b2d)


def _phase_interleave(x_nhwc, oh, ow):
    """Zero-pad + space-to-depth: (N,H,W,Cin) -> (N, rtot, 4*Cin) flat phase slab."""
    n, h, w, cin = x_nhwc.shape
    ohp, owp = oh + 2, ow + 2
    xp = jnp.pad(x_nhwc, ((0, 0),
                          (PADDING, 2 * ohp - h - PADDING),
                          (PADDING, 2 * owp - w - PADDING),
                          (0, 0)))                                  # (N, 2*OHp, 2*OWp, Cin)
    ph = jnp.stack([xp[:, a::2, b::2, :] for a in range(2) for b in range(2)],
                   axis=3)                                          # (N, OHp, OWp, 4, Cin)
    ph = ph.reshape(n, ohp * owp, 4 * cin)
    mb = oh * owp                                                   # shrunk overshoot grid
    rtot = mb + 2 * owp + 2                                         # = OHp*OWp + 2 (halo)
    ph = jnp.pad(ph, ((0, 0), (0, rtot - ohp * owp), (0, 0)))
    return ph, mb, rtot, owp


def _weights_cells(w_oihw):
    """(Cout,Cin,5,5) -> (9, 4*Cin, Cout): per (ki//2,kj//2) cell, phase-major K rows."""
    cout, cin = w_oihw.shape[0], w_oihw.shape[1]
    wc = jnp.zeros((3, 3, 4, cin, cout), jnp.float32)
    for ki in range(KERNEL_SIZE):
        for kj in range(KERNEL_SIZE):
            p = (ki % 2) * 2 + (kj % 2)
            wc = wc.at[ki // 2, kj // 2, p].set(jnp.transpose(w_oihw[:, :, ki, kj]))
    return wc.reshape(9, 4 * cin, cout)


def conv2d_cells_pallas(x_nhwc, w_oihw, bias, oh, ow, *,
                        apply_leaky, emit_stats, out_dtype):
    """Conv2d(k=5,s=2,p=2) for Cin>=64 via 9 cell matmuls with K = 4*Cin."""
    n, h, w, cin = x_nhwc.shape
    cout = w_oihw.shape[0]

    phases, mb, rtot, owp = _phase_interleave(x_nhwc.astype(jnp.bfloat16), oh, ow)

    wcells = _weights_cells(w_oihw).astype(jnp.bfloat16)            # (9, 4*Cin, Cout)
    head_vpu = (cout == 1)
    tn = _pick_tn(cout)
    nj = cout // tn
    if head_vpu:
        wk = jnp.transpose(wcells, (0, 2, 1))                       # (9, 1, 4*Cin)
        w_spec = pl.BlockSpec((9, cout, 4 * cin), lambda j, b: (0, 0, 0))
    else:
        wk = wcells
        w_spec = pl.BlockSpec((9, 4 * cin, tn), lambda j, b: (0, 0, j))
    b2d = bias.reshape(1, cout).astype(jnp.float32)

    kernel = functools.partial(_conv_cells_kernel, mb=mb, owp=owp, ow=ow,
                               apply_leaky=apply_leaky, emit_stats=emit_stats,
                               head_vpu=head_vpu)

    out_shape = jax.ShapeDtypeStruct((n, mb, cout), out_dtype)
    out_spec = pl.BlockSpec((1, mb, tn), lambda j, b: (b, 0, j))
    if emit_stats:
        out_shape = (out_shape, jax.ShapeDtypeStruct((n, 2, cout), jnp.float32))
        out_spec = (out_spec, pl.BlockSpec((1, 2, tn), lambda j, b: (b, 0, j)))

    res = pl.pallas_call(
        kernel,
        # Cout-tile axis outermost so the (9,4Cin,TN) weight slab stays VMEM-resident
        # across the batch axis; both axes "parallel" for megacore sharding.
        grid=(nj, n),
        in_specs=[pl.BlockSpec((1, rtot, 4 * cin), lambda j, b: (b, 0, 0)),
                  w_spec,
                  pl.BlockSpec((1, tn), lambda j, b: (0, j))],
        out_specs=out_spec,
        out_shape=out_shape,
        compiler_params=pltpu.CompilerParams(
            dimension_semantics=("parallel", "parallel"),
            vmem_limit_bytes=VMEM_LIMIT),
    )(phases, wk, b2d)

    if emit_stats:
        act, stats = res
    else:
        act, stats = res, None
    return act, stats, owp


def batchnorm_leaky_pallas(act, stats, gamma, beta, valid_count):
    """Training-mode BN (batch stats from the conv epilogue) + LeakyReLU, tiled."""
    n, mb, c = act.shape
    ssum = jnp.sum(stats[:, 0, :], axis=0)
    ssq = jnp.sum(stats[:, 1, :], axis=0)
    mean = ssum / valid_count
    var = jnp.maximum(ssq / valid_count - mean * mean, 0.0)   # biased var, matches PyTorch
    inv = lax.rsqrt(var + BN_EPS)
    a = (gamma * inv).astype(jnp.float32).reshape(1, c)
    b = (beta - mean * gamma * inv).astype(jnp.float32).reshape(1, c)

    tr = mb if mb <= 2048 else 1024          # row tile (multiple of 8 when tiled)
    grid = (n, pl.cdiv(mb, tr))
    return pl.pallas_call(
        _bn_leaky_apply_kernel,
        grid=grid,
        in_specs=[pl.BlockSpec((1, tr, c), lambda i, t: (i, t, 0)),
                  pl.BlockSpec((1, c), lambda i, t: (0, 0)),
                  pl.BlockSpec((1, c), lambda i, t: (0, 0))],
        out_specs=pl.BlockSpec((1, tr, c), lambda i, t: (i, t, 0)),
        out_shape=jax.ShapeDtypeStruct((n, mb, c), jnp.bfloat16),
        compiler_params=pltpu.CompilerParams(
            dimension_semantics=("parallel", "parallel"),
            vmem_limit_bytes=VMEM_LIMIT),
    )(act, a, b)


# ------------------------- parameter setup & forward ------------------------

def init_params(key, num_layers):
    """Deterministic synthetic parameters matching SGANDiscrimantor.__init__ shapes."""
    num_filters = [2 ** (i + 6) for i in range(num_layers - 1)] + [1]
    params = []
    for i in range(num_layers):
        cin = 3 if i == 0 else num_filters[i - 1]
        cout = num_filters[i]
        key, k1, k2 = jax.random.split(key, 3)
        layer = {
            "w": jax.random.normal(k1, (cout, cin, KERNEL_SIZE, KERNEL_SIZE),
                                   jnp.float32) * 0.05,
            "b": jax.random.normal(k2, (cout,), jnp.float32) * 0.05,
        }
        if 0 < i < num_layers - 1:       # BatchNorm2d only for middle layers
            layer["gamma"] = jnp.ones((cout,), jnp.float32)
            layer["beta"] = jnp.zeros((cout,), jnp.float32)
        params.append(layer)
    return params


def sgan_discriminator_forward(params, x_nchw):
    num_layers = len(params)
    x = jnp.transpose(x_nchw, (0, 2, 3, 1))                   # NCHW -> NHWC (C on lanes)
    for i, layer in enumerate(params):
        is_last = i == num_layers - 1
        has_bn = "gamma" in layer
        n, h, w, _ = x.shape
        cout = layer["w"].shape[0]
        oh = (h + 2 * PADDING - KERNEL_SIZE) // STRIDE + 1
        ow = (w + 2 * PADDING - KERNEL_SIZE) // STRIDE + 1
        apply_leaky = (not is_last) and (not has_bn)
        out_dtype = jnp.float32 if is_last else jnp.bfloat16  # bf16 intermediates

        if i == 0:
            act = conv2d_im2col_pallas(x, layer["w"], layer["b"], oh, ow,
                                       apply_leaky=apply_leaky, out_dtype=out_dtype)
            x = act.reshape(n, oh, ow, cout)
        else:
            act, stats, owp = conv2d_cells_pallas(
                x, layer["w"], layer["b"], oh, ow,
                apply_leaky=apply_leaky, emit_stats=has_bn, out_dtype=out_dtype)
            if has_bn:
                act = batchnorm_leaky_pallas(act, stats, layer["gamma"], layer["beta"],
                                             valid_count=float(n * oh * ow))
            # (N, OH*OWp, C) -> (N, OH, OW, C): drop the overshoot columns
            x = act.reshape(n, oh, owp, cout)[:, :, :ow, :]
    return jnp.transpose(x, (0, 3, 1, 2)).astype(jnp.float32)  # back to NCHW


# ------------------------------ reference -----------------------------------

def _reference_forward(params, x_nchw):
    """Pure-JAX f32 reference (lax conv + training-mode BN + LeakyReLU)."""
    num_layers = len(params)
    x = x_nchw
    for i, layer in enumerate(params):
        x = lax.conv_general_dilated(
            x, layer["w"], window_strides=(STRIDE, STRIDE),
            padding=((PADDING, PADDING), (PADDING, PADDING)),
            dimension_numbers=("NCHW", "OIHW", "NCHW"))
        x = x + layer["b"].reshape(1, -1, 1, 1)
        if "gamma" in layer:
            mean = jnp.mean(x, axis=(0, 2, 3), keepdims=True)
            var = jnp.mean((x - mean) ** 2, axis=(0, 2, 3), keepdims=True)
            x = (x - mean) * lax.rsqrt(var + BN_EPS)
            x = x * layer["gamma"].reshape(1, -1, 1, 1) + layer["beta"].reshape(1, -1, 1, 1)
        if i < num_layers - 1:
            x = jnp.where(x > 0, x, LEAKY_SLOPE * x)
    return x


if __name__ == "__main__":
    num_layers = 3   # conv(3->64)+LReLU, conv(64->128)+BN+LReLU, conv(128->1)
    key = jax.random.PRNGKey(0)
    kp, kx = jax.random.split(key)
    params = init_params(kp, num_layers)
    x = jax.random.normal(kx, (2, 3, 16, 16), jnp.float32)       # NCHW like PyTorch

    fwd = jax.jit(sgan_discriminator_forward)
    out = fwd(params, x)
    jax.block_until_ready(out)
    assert out.shape == (2, 1, 2, 2), out.shape                  # 16 -> 8 -> 4 -> 2 spatial

    ref = _reference_forward(params, x)
    rel_err = float(jnp.max(jnp.abs(out - ref)) / (jnp.max(jnp.abs(ref)) + 1e-6))
    # bf16 MXU operands + bf16 intermediate activations (f32 accumulation/BN math)
    # -> loose tolerance vs the f32 reference.
    assert rel_err < 0.15, f"mismatch vs f32 reference: rel_err={rel_err}"
    print("KERNEL_OK")
</pallas_src>

<mosaic_0001>
module attributes {stable_mosaic.version = 11 : i64} {
  func.func @_conv_im2col_kernel(%arg0: i32, %arg1: i32, %arg2: memref<1x64x80xbf16, #tpu.memory_space<vmem>>, %arg3: memref<80x64xbf16, #tpu.memory_space<vmem>>, %arg4: memref<1x64xf32, #tpu.memory_space<vmem>>, %arg5: memref<1x64x64xbf16, #tpu.memory_space<vmem>>) attributes {dimension_semantics = [#tpu.dimension_semantics<parallel>, #tpu.dimension_semantics<parallel>], iteration_bounds = array<i64: 1, 2>, scalar_prefetch = 0 : i64, scratch_operands = 0 : i64, tpu.core_type = #tpu.core_type<tc>, window_params = [{transform_indices = @transform_0, window_bounds = array<i64: 1, 64, 80>}, {transform_indices = @transform_1, window_bounds = array<i64: 80, 64>}, {transform_indices = @transform_2, window_bounds = array<i64: 1, 64>}, {transform_indices = @transform_3, window_bounds = array<i64: 1, 64, 64>}]} {
    %c0 = arith.constant 0 : index
    %c0_0 = arith.constant 0 : index
    %c0_1 = arith.constant 0 : index
    %0 = vector.load %arg2[%c0, %c0_0, %c0_1] : memref<1x64x80xbf16, #tpu.memory_space<vmem>>, vector<1x64x80xbf16>
    %1 = vector.shape_cast %0 : vector<1x64x80xbf16> to vector<64x80xbf16>
    %c0_2 = arith.constant 0 : index
    %c0_3 = arith.constant 0 : index
    %2 = vector.load %arg3[%c0_2, %c0_3] : memref<80x64xbf16, #tpu.memory_space<vmem>>, vector<80x64xbf16>
    %cst = arith.constant dense<0.000000e+00> : vector<64x64xf32>
    %3 = tpu.matmul %1, %2, %cst {dimension_numbers = #tpu.dot_dimension_numbers<[1], [0], [0], [1], [0, 0, 1, 1], [], []>} : vector<64x80xbf16>, vector<80x64xbf16>, vector<64x64xf32> -> vector<64x64xf32>
    %c0_4 = arith.constant 0 : index
    %c0_5 = arith.constant 0 : index
    %4 = vector.load %arg4[%c0_4, %c0_5] : memref<1x64xf32, #tpu.memory_space<vmem>>, vector<1x64xf32>
    %5 = vector.broadcast %4 : vector<1x64xf32> to vector<64x64xf32>
    %6 = arith.addf %3, %5 : vector<64x64xf32>
    %cst_6 = arith.constant 2.000000e-01 : f32
    %7 = vector.broadcast %cst_6 : f32 to vector<64x64xf32>
    %8 = arith.mulf %7, %6 : vector<64x64xf32>
    %9 = arith.maximumf %6, %8 : vector<64x64xf32>
    %10 = arith.truncf %9 : vector<64x64xf32> to vector<64x64xbf16>
    %c0_7 = arith.constant 0 : index
    %c0_8 = arith.constant 0 : index
    %c0_9 = arith.constant 0 : index
    %11 = vector.load %arg5[%c0_7, %c0_8, %c0_9] : memref<1x64x64xbf16, #tpu.memory_space<vmem>>, vector<1x64x64xbf16>
    %12 = vector.shape_cast %11 : vector<1x64x64xbf16> to vector<64x64xbf16>
    %13 = vector.shape_cast %10 : vector<64x64xbf16> to vector<1x64x64xbf16>
    tpu.vector_store %arg5[%c0_7, %c0_8, %c0_9], %13 {strides = array<i32>} : memref<1x64x64xbf16, #tpu.memory_space<vmem>>, vector<1x64x64xbf16>,
    return
  }
  func.func @transform_0(%arg0: i32, %arg1: i32) -> (i32, i32, i32) {
    %c0_i32 = arith.constant 0 : i32
    %c0_i32_0 = arith.constant 0 : i32
    %c0_i32_1 = arith.constant 0 : i32
    return %arg1, %c0_i32, %c0_i32_0 : i32, i32, i32
  }
  func.func @transform_1(%arg0: i32, %arg1: i32) -> (i32, i32) {
    %c0_i32 = arith.constant 0 : i32
    %c0_i32_0 = arith.constant 0 : i32
    return %c0_i32, %arg0 : i32, i32
  }
  func.func @transform_2(%arg0: i32, %arg1: i32) -> (i32, i32) {
    %c0_i32 = arith.constant 0 : i32
    %c0_i32_0 = arith.constant 0 : i32
    return %c0_i32, %arg0 : i32, i32
  }
  func.func @transform_3(%arg0: i32, %arg1: i32) -> (i32, i32, i32) {
    %c0_i32 = arith.constant 0 : i32
    %c0_i32_0 = arith.constant 0 : i32
    return %arg1, %c0_i32, %arg0 : i32, i32, i32
  }
}

module attributes {stable_mosaic.version = 11 : i64} {
  func.func @_conv_cells_kernel(%arg0: i32, %arg1: i32, %arg2: memref<1x38x256xbf16, #tpu.memory_space<vmem>>, %arg3: memref<9x256x128xbf16, #tpu.memory_space<vmem>>, %arg4: memref<1x128xf32, #tpu.memory_space<vmem>>, %arg5: memref<1x24x128xbf16, #tpu.memory_space<vmem>>, %arg6: memref<1x2x128xf32, #tpu.memory_space<vmem>>) attributes {dimension_semantics = [#tpu.dimension_semantics<parallel>, #tpu.dimension_semantics<parallel>], iteration_bounds = array<i64: 1, 2>, scalar_prefetch = 0 : i64, scratch_operands = 0 : i64, tpu.core_type = #tpu.core_type<tc>, window_params = [{transform_indices = @transform_0, window_bounds = array<i64: 1, 38, 256>}, {transform_indices = @transform_1, window_bounds = array<i64: 9, 256, 128>}, {transform_indices = @transform_2, window_bounds = array<i64: 1, 128>}, {transform_indices = @transform_3, window_bounds = array<i64: 1, 24, 128>}, {transform_indices = @transform_4, window_bounds = array<i64: 1, 2, 128>}]} {
    %cst = arith.constant 0.000000e+00 : f32
    %0 = vector.broadcast %cst : f32 to vector<24x128xf32>
    %c0 = arith.constant 0 : index
    %c0_0 = arith.constant 0 : index
    %c0_1 = arith.constant 0 : index
    %1 = vector.load %arg2[%c0, %c0_0, %c0_1] : memref<1x38x256xbf16, #tpu.memory_space<vmem>>, vector<1x24x256xbf16>
    %2 = vector.shape_cast %1 : vector<1x24x256xbf16> to vector<24x256xbf16>
    %c0_2 = arith.constant 0 : index
    %c0_3 = arith.constant 0 : index
    %c0_4 = arith.constant 0 : index
    %3 = vector.load %arg3[%c0_2, %c0_3, %c0_4] : memref<9x256x128xbf16, #tpu.memory_space<vmem>>, vector<1x256x128xbf16>
    %4 = vector.shape_cast %3 : vector<1x256x128xbf16> to vector<256x128xbf16>
    %cst_5 = arith.constant dense<0.000000e+00> : vector<24x128xf32>
    %5 = tpu.matmul %2, %4, %cst_5 {dimension_numbers = #tpu.dot_dimension_numbers<[1], [0], [0], [1], [0, 0, 1, 1], [], []>} : vector<24x256xbf16>, vector<256x128xbf16>, vector<24x128xf32> -> vector<24x128xf32>
    %6 = arith.addf %0, %5 : vector<24x128xf32>
    %c0_6 = arith.constant 0 : index
    %c1 = arith.constant 1 : index
    %c0_7 = arith.constant 0 : index
    %7 = vector.load %arg2[%c0_6, %c1, %c0_7] : memref<1x38x256xbf16, #tpu.memory_space<vmem>>, vector<1x24x256xbf16>
    %8 = vector.shape_cast %7 : vector<1x24x256xbf16> to vector<24x256xbf16>
    %c1_8 = arith.constant 1 : index
    %c0_9 = arith.constant 0 : index
    %c0_10 = arith.constant 0 : index
    %9 = vector.load %arg3[%c1_8, %c0_9, %c0_10] : memref<9x256x128xbf16, #tpu.memory_space<vmem>>, vector<1x256x128xbf16>
    %10 = vector.shape_cast %9 : vector<1x256x128xbf16> to vector<256x128xbf16>
    %cst_11 = arith.constant dense<0.000000e+00> : vector<24x128xf32>
    %11 = tpu.matmul %8, %10, %cst_11 {dimension_numbers = #tpu.dot_dimension_numbers<[1], [0], [0], [1], [0, 0, 1, 1], [], []>} : vector<24x256xbf16>, vector<256x128xbf16>, vector<24x128xf32> -> vector<24x128xf32>
    %12 = arith.addf %6, %11 : vector<24x128xf32>
    %c0_12 = arith.constant 0 : index
    %c2 = arith.constant 2 : index
    %c0_13 = arith.constant 0 : index
    %13 = vector.load %arg2[%c0_12, %c2, %c0_13] : memref<1x38x256xbf16, #tpu.memory_space<vmem>>, vector<1x24x256xbf16>
    %14 = vector.shape_cast %13 : vector<1x24x256xbf16> to vector<24x256xbf16>
    %c2_14 = arith.constant 2 : index
    %c0_15 = arith.constant 0 : index
    %c0_16 = arith.constant 0 : index
    %15 = vector.load %arg3[%c2_14, %c0_15, %c0_16] : memref<9x256x128xbf16, #tpu.memory_space<vmem>>, vector<1x256x128xbf16>
    %16 = vector.shape_cast %15 : vector<1x256x128xbf16> to vector<256x128xbf16>
    %cst_17 = arith.constant dense<0.000000e+00> : vector<24x128xf32>
    %17 = tpu.matmul %14, %16, %cst_17 {dimension_numbers = #tpu.dot_dimension_numbers<[1], [0], [0], [1], [0, 0, 1, 1], [], []>} : vector<24x256xbf16>, vector<256x128xbf16>, vector<24x128xf32> -> vector<24x128xf32>
    %18 = arith.addf %12, %17 : vector<24x128xf32>
    %c0_18 = arith.constant 0 : index
    %c6 = arith.constant 6 : index
    %c0_19 = arith.constant 0 : index
    %19 = vector.load %arg2[%c0_18, %c6, %c0_19] : memref<1x38x256xbf16, #tpu.memory_space<vmem>>, vector<1x24x256xbf16>
    %20 = vector.shape_cast %19 : vector<1x24x256xbf16> to vector<24x256xbf16>
    %c3 = arith.constant 3 : index
    %c0_20 = arith.constant 0 : index
    %c0_21 = arith.constant 0 : index
    %21 = vector.load %arg3[%c3, %c0_20, %c0_21] : memref<9x256x128xbf16, #tpu.memory_space<vmem>>, vector<1x256x128xbf16>
    %22 = vector.shape_cast %21 : vector<1x256x128xbf16> to vector<256x128xbf16>
    %cst_22 = arith.constant dense<0.000000e+00> : vector<24x128xf32>
    %23 = tpu.matmul %20, %22, %cst_22 {dimension_numbers = #tpu.dot_dimension_numbers<[1], [0], [0], [1], [0, 0, 1, 1], [], []>} : vector<24x256xbf16>, vector<256x128xbf16>, vector<24x128xf32> -> vector<24x128xf32>
    %24 = arith.addf %18, %23 : vector<24x128xf32>
    %c0_23 = arith.constant 0 : index
    %c7 = arith.constant 7 : index
    %c0_24 = arith.constant 0 : index
    %25 = vector.load %arg2[%c0_23, %c7, %c0_24] : memref<1x38x256xbf16, #tpu.memory_space<vmem>>, vector<1x24x256xbf16>
    %26 = vector.shape_cast %25 : vector<1x24x256xbf16> to vector<24x256xbf16>
    %c4 = arith.constant 4 : index
    %c0_25 = arith.constant 0 : index
    %c0_26 = arith.constant 0 : index
    %27 = vector.load %arg3[%c4, %c0_25, %c0_26] : memref<9x256x128xbf16, #tpu.memory_space<vmem>>, vector<1x256x128xbf16>
    %28 = vector.shape_cast %27 : vector<1x256x128xbf16> to vector<256x128xbf16>
    %cst_27 = arith.constant dense<0.000000e+00> : vector<24x128xf32>
    %29 = tpu.matmul %26, %28, %cst_27 {dimension_numbers = #tpu.dot_dimension_numbers<[1], [0], [0], [1], [0, 0, 1, 1], [], []>} : vector<24x256xbf16>, vector<256x128xbf16>, vector<24x128xf32> -> vector<24x128xf32>
    %30 = arith.addf %24, %29 : vector<24x128xf32>
    %c0_28 = arith.constant 0 : index
    %c8 = arith.constant 8 : index
    %c0_29 = arith.constant 0 : index
    %31 = vector.load %arg2[%c0_28, %c8, %c0_29] : memref<1x38x256xbf16, #tpu.memory_space<vmem>>, vector<1x24x256xbf16>
    %32 = vector.shape_cast %31 : vector<1x24x256xbf16> to vector<24x256xbf16>
    %c5 = arith.constant 5 : index
    %c0_30 = arith.constant 0 : index
    %c0_31 = arith.constant 0 : index
    %33 = vector.load %arg3[%c5, %c0_30, %c0_31] : memref<9x256x128xbf16, #tpu.memory_space<vmem>>, vector<1x256x128xbf16>
    %34 = vector.shape_cast %33 : vector<1x256x128xbf16> to vector<256x128xbf16>
    %cst_32 = arith.constant dense<0.000000e+00> : vector<24x128xf32>
    %35 = tpu.matmul %32, %34, %cst_32 {dimension_numbers = #tpu.dot_dimension_numbers<[1], [0], [0], [1], [0, 0, 1, 1], [], []>} : vector<24x256xbf16>, vector<256x128xbf16>, vector<24x128xf32> -> vector<24x128xf32>
    %36 = arith.addf %30, %35 : vector<24x128xf32>
    %c0_33 = arith.constant 0 : index
    %c12 = arith.constant 12 : index
    %c0_34 = arith.constant 0 : index
    %37 = vector.load %arg2[%c0_33, %c12, %c0_34] : memref<1x38x256xbf16, #tpu.memory_space<vmem>>, vector<1x24x256xbf16>
    %38 = vector.shape_cast %37 : vector<1x24x256xbf16> to vector<24x256xbf16>
    %c6_35 = arith.constant 6 : index
    %c0_36 = arith.constant 0 : index
    %c0_37 = arith.constant 0 : index
    %39 = vector.load %arg3[%c6_35, %c0_36, %c0_37] : memref<9x256x128xbf16, #tpu.memory_space<vmem>>, vector<1x256x128xbf16>
    %40 = vector.shape_cast %39 : vector<1x256x128xbf16> to vector<256x128xbf16>
    %cst_38 = arith.constant dense<0.000000e+00> : vector<24x128xf32>
    %41 = tpu.matmul %38, %40, %cst_38 {dimension_numbers = #tpu.dot_dimension_numbers<[1], [0], [0], [1], [0, 0, 1, 1], [], []>} : vector<24x256xbf16>, vector<256x128xbf16>, vector<24x128xf32> -> vector<24x128xf32>
    %42 = arith.addf %36, %41 : vector<24x128xf32>
    %c0_39 = arith.constant 0 : index
    %c13 = arith.constant 13 : index
    %c0_40 = arith.constant 0 : index
    %43 = vector.load %arg2[%c0_39, %c13, %c0_40] : memref<1x38x256xbf16, #tpu.memory_space<vmem>>, vector<1x24x256xbf16>
    %44 = vector.shape_cast %43 : vector<1x24x256xbf16> to vector<24x256xbf16>
    %c7_41 = arith.constant 7 : index
    %c0_42 = arith.constant 0 : index
    %c0_43 = arith.constant 0 : index
    %45 = vector.load %arg3[%c7_41, %c0_42, %c0_43] : memref<9x256x128xbf16, #tpu.memory_space<vmem>>, vector<1x256x128xbf16>
    %46 = vector.shape_cast %45 : vector<1x256x128xbf16> to vector<256x128xbf16>
    %cst_44 = arith.constant dense<0.000000e+00> : vector<24x128xf32>
    %47 = tpu.matmul %44, %46, %cst_44 {dimension_numbers = #tpu.dot_dimension_numbers<[1], [0], [0], [1], [0, 0, 1, 1], [], []>} : vector<24x256xbf16>, vector<256x128xbf16>, vector<24x128xf32> -> vector<24x128xf32>
    %48 = arith.addf %42, %47 : vector<24x128xf32>
    %c0_45 = arith.constant 0 : index
    %c14 = arith.constant 14 : index
    %c0_46 = arith.constant 0 : index
    %49 = vector.load %arg2[%c0_45, %c14, %c0_46] : memref<1x38x256xbf16, #tpu.memory_space<vmem>>, vector<1x24x256xbf16>
    %50 = vector.shape_cast %49 : vector<1x24x256xbf16> to vector<24x256xbf16>
    %c8_47 = arith.constant 8 : index
    %c0_48 = arith.constant 0 : index
    %c0_49 = arith.constant 0 : index
    %51 = vector.load %arg3[%c8_47, %c0_48, %c0_49] : memref<9x256x128xbf16, #tpu.memory_space<vmem>>, vector<1x256x128xbf16>
    %52 = vector.shape_cast %51 : vector<1x256x128xbf16> to vector<256x128xbf16>
    %cst_50 = arith.constant dense<0.000000e+00> : vector<24x128xf32>
    %53 = tpu.matmul %50, %52, %cst_50 {dimension_numbers = #tpu.dot_dimension_numbers<[1], [0], [0], [1], [0, 0, 1, 1], [], []>} : vector<24x256xbf16>, vector<256x128xbf16>, vector<24x128xf32> -> vector<24x128xf32>
    %54 = arith.addf %48, %53 : vector<24x128xf32>
    %c0_51 = arith.constant 0 : index
    %c0_52 = arith.constant 0 : index
    %55 = vector.load %arg4[%c0_51, %c0_52] : memref<1x128xf32, #tpu.memory_space<vmem>>, vector<1x128xf32>
    %56 = vector.broadcast %55 : vector<1x128xf32> to vector<24x128xf32>
    %57 = arith.addf %54, %56 : vector<24x128xf32>
    %58 = arith.truncf %57 : vector<24x128xf32> to vector<24x128xbf16>
    %c0_53 = arith.constant 0 : index
    %c0_54 = arith.constant 0 : index
    %c0_55 = arith.constant 0 : index
    %59 = vector.load %arg5[%c0_53, %c0_54, %c0_55] : memref<1x24x128xbf16, #tpu.memory_space<vmem>>, vector<1x24x128xbf16>
    %60 = vector.shape_cast %59 : vector<1x24x128xbf16> to vector<24x128xbf16>
    %61 = vector.shape_cast %58 : vector<24x128xbf16> to vector<1x24x128xbf16>
    tpu.vector_store %arg5[%c0_53, %c0_54, %c0_55], %61 {strides = array<i32>} : memref<1x24x128xbf16, #tpu.memory_space<vmem>>, vector<1x24x128xbf16>,
    %62 = tpu.iota {dimensions = array<i32: 0>} : vector<24x1xi32>
    %c6_i32 = arith.constant 6 : i32
    %c0_i32 = arith.constant 0 : i32
    %63 = arith.cmpi eq, %c6_i32, %c0_i32 : i32
    %c1_i32 = arith.constant 1 : i32
    %64 = arith.select %63, %c1_i32, %c6_i32 : i32
    %65 = vector.broadcast %64 : i32 to vector<24x1xi32>
    %66 = arith.remsi %62, %65 : vector<24x1xi32>
    %c0_i32_56 = arith.constant 0 : i32
    %67 = vector.broadcast %c0_i32_56 : i32 to vector<24x1xi32>
    %68 = arith.cmpi ne, %66, %67 : vector<24x1xi32>
    %c0_i32_57 = arith.constant 0 : i32
    %69 = vector.broadcast %c0_i32_57 : i32 to vector<24x1xi32>
    %70 = arith.cmpi slt, %66, %69 : vector<24x1xi32>
    %c0_i32_58 = arith.constant 0 : i32
    %71 = arith.cmpi slt, %64, %c0_i32_58 : i32
    %72 = vector.broadcast %71 : i1 to vector<24x1xi1>
    %73 = vector.broadcast %72 : vector<24x1xi1> to vector<24x1xi1>
    %74 = arith.xori %70, %73 : vector<24x1xi1>
    %75 = arith.andi %74, %68 : vector<24x1xi1>
    %76 = vector.broadcast %64 : i32 to vector<24x1xi32>
    %77 = arith.addi %66, %76 : vector<24x1xi32>
    %78 = arith.select %75, %77, %66 : vector<24x1xi1>, vector<24x1xi32>
    %c4_i32 = arith.constant 4 : i32
    %79 = vector.broadcast %c4_i32 : i32 to vector<24x1xi32>
    %80 = arith.cmpi slt, %78, %79 : vector<24x1xi32>
    %81 = arith.extui %80 : vector<24x1xi1> to vector<24x1xi32>
    %82 = arith.sitofp %81 : vector<24x1xi32> to vector<24x1xf32>
    %83 = vector.broadcast %82 : vector<24x1xf32> to vector<24x128xf32>
    %84 = arith.mulf %57, %83 : vector<24x128xf32>
    %cst_59 = arith.constant dense<0.000000e+00> : vector<128xf32>
    %85 = vector.multi_reduction <add>, %84, %cst_59 [0] : vector<24x128xf32> to vector<128xf32>
    %86 = vector.shape_cast %85 : vector<128xf32> to vector<1x128xf32>
    %c0_60 = arith.constant 0 : index
    %c0_61 = arith.constant 0 : index
    %c0_62 = arith.constant 0 : index
    %87 = vector.load %arg6[%c0_60, %c0_61, %c0_62] : memref<1x2x128xf32, #tpu.memory_space<vmem>>, vector<1x1x128xf32>
    %88 = vector.shape_cast %87 : vector<1x1x128xf32> to vector<1x128xf32>
    %89 = vector.shape_cast %86 : vector<1x128xf32> to vector<1x1x128xf32>
    tpu.vector_store %arg6[%c0_60, %c0_61, %c0_62], %89 {strides = array<i32>} : memref<1x2x128xf32, #tpu.memory_space<vmem>>, vector<1x1x128xf32>,
    %90 = arith.mulf %57, %57 : vector<24x128xf32>
    %91 = vector.broadcast %82 : vector<24x1xf32> to vector<24x128xf32>
    %92 = arith.mulf %90, %91 : vector<24x128xf32>
    %cst_63 = arith.constant dense<0.000000e+00> : vector<128xf32>
    %93 = vector.multi_reduction <add>, %92, %cst_63 [0] : vector<24x128xf32> to vector<128xf32>
    %94 = vector.shape_cast %93 : vector<128xf32> to vector<1x128xf32>
    %c0_64 = arith.constant 0 : index
    %c1_65 = arith.constant 1 : index
    %c0_66 = arith.constant 0 : index
    %95 = vector.load %arg6[%c0_64, %c1_65, %c0_66] : memref<1x2x128xf32, #tpu.memory_space<vmem>>, vector<1x1x128xf32>
    %96 = vector.shape_cast %95 : vector<1x1x128xf32> to vector<1x128xf32>
    %97 = vector.shape_cast %94 : vector<1x128xf32> to vector<1x1x128xf32>
    tpu.vector_store %arg6[%c0_64, %c1_65, %c0_66], %97 {strides = array<i32>} : memref<1x2x128xf32, #tpu.memory_space<vmem>>, vector<1x1x128xf32>,
    return
  }
  func.func @transform_0(%arg0: i32, %arg1: i32) -> (i32, i32, i32) {
    %c0_i32 = arith.constant 0 : i32
    %c0_i32_0 = arith.constant 0 : i32
    %c0_i32_1 = arith.constant 0 : i32
    return %arg1, %c0_i32, %c0_i32_0 : i32, i32, i32
  }
  func.func @transform_1(%arg0: i32, %arg1: i32) -> (i32, i32, i32) {
    %c0_i32 = arith.constant 0 : i32
    %c0_i32_0 = arith.constant 0 : i32
    %c0_i32_1 = arith.constant 0 : i32
    return %c0_i32, %c0_i32_0, %arg0 : i32, i32, i32
  }
  func.func @transform_2(%arg0: i32, %arg1: i32) -> (i32, i32) {
    %c0_i32 = arith.constant 0 : i32
    %c0_i32_0 = arith.constant 0 : i32
    return %c0_i32, %arg0 : i32, i32
  }
  func.func @transform_3(%arg0: i32, %arg1: i32) -> (i32, i32, i32) {
    %c0_i32 = arith.constant 0 : i32
    %c0_i32_0 = arith.constant 0 : i32
    return %arg1, %c0_i32, %arg0 : i32, i32, i32
  }
  func.func @transform_4(%arg0: i32, %arg1: i32) -> (i32, i32, i32) {
    %c0_i32 = arith.constant 0 : i32
    %c0_i32_0 = arith.constant 0 : i32
    return %arg1, %c0_i32, %arg0 : i32, i32, i32
  }
}

module attributes {stable_mosaic.version = 11 : i64} {
  func.func @_bn_leaky_apply_kernel(%arg0: i32, %arg1: i32, %arg2: memref<1x24x128xbf16, #tpu.memory_space<vmem>>, %arg3: memref<1x128xf32, #tpu.memory_space<vmem>>, %arg4: memref<1x128xf32, #tpu.memory_space<vmem>>, %arg5: memref<1x24x128xbf16, #tpu.memory_space<vmem>>) attributes {dimension_semantics = [#tpu.dimension_semantics<parallel>, #tpu.dimension_semantics<parallel>], iteration_bounds = array<i64: 2, 1>, scalar_prefetch = 0 : i64, scratch_operands = 0 : i64, tpu.core_type = #tpu.core_type<tc>, window_params = [{transform_indices = @transform_0, window_bounds = array<i64: 1, 24, 128>}, {pipeline_mode = #tpu.pipeline_mode<synchronous>, transform_indices = @transform_1, window_bounds = array<i64: 1, 128>}, {pipeline_mode = #tpu.pipeline_mode<synchronous>, transform_indices = @transform_2, window_bounds = array<i64: 1, 128>}, {transform_indices = @transform_3, window_bounds = array<i64: 1, 24, 128>}]} {
    %c0 = arith.constant 0 : index
    %c0_0 = arith.constant 0 : index
    %c0_1 = arith.constant 0 : index
    %0 = vector.load %arg2[%c0, %c0_0, %c0_1] : memref<1x24x128xbf16, #tpu.memory_space<vmem>>, vector<1x24x128xbf16>
    %1 = vector.shape_cast %0 : vector<1x24x128xbf16> to vector<24x128xbf16>
    %2 = arith.extf %1 : vector<24x128xbf16> to vector<24x128xf32>
    %c0_2 = arith.constant 0 : index
    %c0_3 = arith.constant 0 : index
    %3 = vector.load %arg3[%c0_2, %c0_3] : memref<1x128xf32, #tpu.memory_space<vmem>>, vector<1x128xf32>
    %4 = vector.broadcast %3 : vector<1x128xf32> to vector<24x128xf32>
    %5 = arith.mulf %2, %4 : vector<24x128xf32>
    %c0_4 = arith.constant 0 : index
    %c0_5 = arith.constant 0 : index
    %6 = vector.load %arg4[%c0_4, %c0_5] : memref<1x128xf32, #tpu.memory_space<vmem>>, vector<1x128xf32>
    %7 = vector.broadcast %6 : vector<1x128xf32> to vector<24x128xf32>
    %8 = arith.addf %5, %7 : vector<24x128xf32>
    %cst = arith.constant 2.000000e-01 : f32
    %9 = vector.broadcast %cst : f32 to vector<24x128xf32>
    %10 = arith.mulf %9, %8 : vector<24x128xf32>
    %11 = arith.maximumf %8, %10 : vector<24x128xf32>
    %12 = arith.truncf %11 : vector<24x128xf32> to vector<24x128xbf16>
    %c0_6 = arith.constant 0 : index
    %c0_7 = arith.constant 0 : index
    %c0_8 = arith.constant 0 : index
    %13 = vector.load %arg5[%c0_6, %c0_7, %c0_8] : memref<1x24x128xbf16, #tpu.memory_space<vmem>>, vector<1x24x128xbf16>
    %14 = vector.shape_cast %13 : vector<1x24x128xbf16> to vector<24x128xbf16>
    %15 = vector.shape_cast %12 : vector<24x128xbf16> to vector<1x24x128xbf16>
    tpu.vector_store %arg5[%c0_6, %c0_7, %c0_8], %15 {strides = array<i32>} : memref<1x24x128xbf16, #tpu.memory_space<vmem>>, vector<1x24x128xbf16>,
    return
  }
  func.func @transform_0(%arg0: i32, %arg1: i32) -> (i32, i32, i32) {
    %c0_i32 = arith.constant 0 : i32
    %c0_i32_0 = arith.constant 0 : i32
    return %arg0, %arg1, %c0_i32 : i32, i32, i32
  }
  func.func @transform_1(%arg0: i32, %arg1: i32) -> (i32, i32) {
    %c0_i32 = arith.constant 0 : i32
    %c0_i32_0 = arith.constant 0 : i32
    %c0_i32_1 = arith.constant 0 : i32
    return %c0_i32, %c0_i32_0 : i32, i32
  }
  func.func @transform_2(%arg0: i32, %arg1: i32) -> (i32, i32) {
    %c0_i32 = arith.constant 0 : i32
    %c0_i32_0 = arith.constant 0 : i32
    %c0_i32_1 = arith.constant 0 : i32
    return %c0_i32, %c0_i32_0 : i32, i32
  }
  func.func @transform_3(%arg0: i32, %arg1: i32) -> (i32, i32, i32) {
    %c0_i32 = arith.constant 0 : i32
    %c0_i32_0 = arith.constant 0 : i32
    return %arg0, %arg1, %c0_i32 : i32, i32, i32
  }
}

module attributes {stable_mosaic.version = 11 : i64} {
  func.func @_conv_cells_kernel(%arg0: i32, %arg1: i32, %arg2: memref<1x18x512xbf16, #tpu.memory_space<vmem>>, %arg3: memref<9x1x512xbf16, #tpu.memory_space<vmem>>, %arg4: memref<1x1xf32, #tpu.memory_space<vmem>>, %arg5: memref<1x8x1xf32, #tpu.memory_space<vmem>>) attributes {dimension_semantics = [#tpu.dimension_semantics<parallel>, #tpu.dimension_semantics<parallel>], iteration_bounds = array<i64: 1, 2>, scalar_prefetch = 0 : i64, scratch_operands = 0 : i64, tpu.core_type = #tpu.core_type<tc>, window_params = [{transform_indices = @transform_0, window_bounds = array<i64: 1, 18, 512>}, {pipeline_mode = #tpu.pipeline_mode<synchronous>, transform_indices = @transform_1, window_bounds = array<i64: 9, 1, 512>}, {transform_indices = @transform_2, window_bounds = array<i64: 1, 1>}, {transform_indices = @transform_3, window_bounds = array<i64: 1, 8, 1>}]} {
    %cst = arith.constant 0.000000e+00 : f32
    %0 = vector.broadcast %cst : f32 to vector<8x1xf32>
    %c0 = arith.constant 0 : index
    %c0_0 = arith.constant 0 : index
    %c0_1 = arith.constant 0 : index
    %1 = vector.load %arg2[%c0, %c0_0, %c0_1] : memref<1x18x512xbf16, #tpu.memory_space<vmem>>, vector<1x8x512xbf16>
    %2 = vector.shape_cast %1 : vector<1x8x512xbf16> to vector<8x512xbf16>
    %c0_2 = arith.constant 0 : index
    %c0_3 = arith.constant 0 : index
    %c0_4 = arith.constant 0 : index
    %3 = vector.load %arg3[%c0_2, %c0_3, %c0_4] : memref<9x1x512xbf16, #tpu.memory_space<vmem>>, vector<1x1x512xbf16>
    %4 = vector.shape_cast %3 : vector<1x1x512xbf16> to vector<1x512xbf16>
    %5 = arith.extf %4 : vector<1x512xbf16> to vector<1x512xf32>
    %6 = arith.extf %2 : vector<8x512xbf16> to vector<8x512xf32>
    %7 = vector.broadcast %5 : vector<1x512xf32> to vector<8x512xf32>
    %8 = arith.mulf %6, %7 : vector<8x512xf32>
    %cst_5 = arith.constant dense<0.000000e+00> : vector<8xf32>
    %9 = vector.multi_reduction <add>, %8, %cst_5 [1] : vector<8x512xf32> to vector<8xf32>
    %10 = vector.shape_cast %9 : vector<8xf32> to vector<8x1xf32>
    %11 = arith.addf %0, %10 : vector<8x1xf32>
    %c0_6 = arith.constant 0 : index
    %c1 = arith.constant 1 : index
    %c0_7 = arith.constant 0 : index
    %12 = vector.load %arg2[%c0_6, %c1, %c0_7] : memref<1x18x512xbf16, #tpu.memory_space<vmem>>, vector<1x8x512xbf16>
    %13 = vector.shape_cast %12 : vector<1x8x512xbf16> to vector<8x512xbf16>
    %c1_8 = arith.constant 1 : index
    %c0_9 = arith.constant 0 : index
    %c0_10 = arith.constant 0 : index
    %14 = vector.load %arg3[%c1_8, %c0_9, %c0_10] : memref<9x1x512xbf16, #tpu.memory_space<vmem>>, vector<1x1x512xbf16>
    %15 = vector.shape_cast %14 : vector<1x1x512xbf16> to vector<1x512xbf16>
    %16 = arith.extf %15 : vector<1x512xbf16> to vector<1x512xf32>
    %17 = arith.extf %13 : vector<8x512xbf16> to vector<8x512xf32>
    %18 = vector.broadcast %16 : vector<1x512xf32> to vector<8x512xf32>
    %19 = arith.mulf %17, %18 : vector<8x512xf32>
    %cst_11 = arith.constant dense<0.000000e+00> : vector<8xf32>
    %20 = vector.multi_reduction <add>, %19, %cst_11 [1] : vector<8x512xf32> to vector<8xf32>
    %21 = vector.shape_cast %20 : vector<8xf32> to vector<8x1xf32>
    %22 = arith.addf %11, %21 : vector<8x1xf32>
    %c0_12 = arith.constant 0 : index
    %c2 = arith.constant 2 : index
    %c0_13 = arith.constant 0 : index
    %23 = vector.load %arg2[%c0_12, %c2, %c0_13] : memref<1x18x512xbf16, #tpu.memory_space<vmem>>, vector<1x8x512xbf16>
    %24 = vector.shape_cast %23 : vector<1x8x512xbf16> to vector<8x512xbf16>
    %c2_14 = arith.constant 2 : index
    %c0_15 = arith.constant 0 : index
    %c0_16 = arith.constant 0 : index
    %25 = vector.load %arg3[%c2_14, %c0_15, %c0_16] : memref<9x1x512xbf16, #tpu.memory_space<vmem>>, vector<1x1x512xbf16>
    %26 = vector.shape_cast %25 : vector<1x1x512xbf16> to vector<1x512xbf16>
    %27 = arith.extf %26 : vector<1x512xbf16> to vector<1x512xf32>
    %28 = arith.extf %24 : vector<8x512xbf16> to vector<8x512xf32>
    %29 = vector.broadcast %27 : vector<1x512xf32> to vector<8x512xf32>
    %30 = arith.mulf %28, %29 : vector<8x512xf32>
    %cst_17 = arith.constant dense<0.000000e+00> : vector<8xf32>
    %31 = vector.multi_reduction <add>, %30, %cst_17 [1] : vector<8x512xf32> to vector<8xf32>
    %32 = vector.shape_cast %31 : vector<8xf32> to vector<8x1xf32>
    %33 = arith.addf %22, %32 : vector<8x1xf32>
    %c0_18 = arith.constant 0 : index
    %c4 = arith.constant 4 : index
    %c0_19 = arith.constant 0 : index
    %34 = vector.load %arg2[%c0_18, %c4, %c0_19] : memref<1x18x512xbf16, #tpu.memory_space<vmem>>, vector<1x8x512xbf16>
    %35 = vector.shape_cast %34 : vector<1x8x512xbf16> to vector<8x512xbf16>
    %c3 = arith.constant 3 : index
    %c0_20 = arith.constant 0 : index
    %c0_21 = arith.constant 0 : index
    %36 = vector.load %arg3[%c3, %c0_20, %c0_21] : memref<9x1x512xbf16, #tpu.memory_space<vmem>>, vector<1x1x512xbf16>
    %37 = vector.shape_cast %36 : vector<1x1x512xbf16> to vector<1x512xbf16>
    %38 = arith.extf %37 : vector<1x512xbf16> to vector<1x512xf32>
    %39 = arith.extf %35 : vector<8x512xbf16> to vector<8x512xf32>
    %40 = vector.broadcast %38 : vector<1x512xf32> to vector<8x512xf32>
    %41 = arith.mulf %39, %40 : vector<8x512xf32>
    %cst_22 = arith.constant dense<0.000000e+00> : vector<8xf32>
    %42 = vector.multi_reduction <add>, %41, %cst_22 [1] : vector<8x512xf32> to vector<8xf32>
    %43 = vector.shape_cast %42 : vector<8xf32> to vector<8x1xf32>
    %44 = arith.addf %33, %43 : vector<8x1xf32>
    %c0_23 = arith.constant 0 : index
    %c5 = arith.constant 5 : index
    %c0_24 = arith.constant 0 : index
    %45 = vector.load %arg2[%c0_23, %c5, %c0_24] : memref<1x18x512xbf16, #tpu.memory_space<vmem>>, vector<1x8x512xbf16>
    %46 = vector.shape_cast %45 : vector<1x8x512xbf16> to vector<8x512xbf16>
    %c4_25 = arith.constant 4 : index
    %c0_26 = arith.constant 0 : index
    %c0_27 = arith.constant 0 : index
    %47 = vector.load %arg3[%c4_25, %c0_26, %c0_27] : memref<9x1x512xbf16, #tpu.memory_space<vmem>>, vector<1x1x512xbf16>
    %48 = vector.shape_cast %47 : vector<1x1x512xbf16> to vector<1x512xbf16>
    %49 = arith.extf %48 : vector<1x512xbf16> to vector<1x512xf32>
    %50 = arith.extf %46 : vector<8x512xbf16> to vector<8x512xf32>
    %51 = vector.broadcast %49 : vector<1x512xf32> to vector<8x512xf32>
    %52 = arith.mulf %50, %51 : vector<8x512xf32>
    %cst_28 = arith.constant dense<0.000000e+00> : vector<8xf32>
    %53 = vector.multi_reduction <add>, %52, %cst_28 [1] : vector<8x512xf32> to vector<8xf32>
    %54 = vector.shape_cast %53 : vector<8xf32> to vector<8x1xf32>
    %55 = arith.addf %44, %54 : vector<8x1xf32>
    %c0_29 = arith.constant 0 : index
    %c6 = arith.constant 6 : index
    %c0_30 = arith.constant 0 : index
    %56 = vector.load %arg2[%c0_29, %c6, %c0_30] : memref<1x18x512xbf16, #tpu.memory_space<vmem>>, vector<1x8x512xbf16>
    %57 = vector.shape_cast %56 : vector<1x8x512xbf16> to vector<8x512xbf16>
    %c5_31 = arith.constant 5 : index
    %c0_32 = arith.constant 0 : index
    %c0_33 = arith.constant 0 : index
    %58 = vector.load %arg3[%c5_31, %c0_32, %c0_33] : memref<9x1x512xbf16, #tpu.memory_space<vmem>>, vector<1x1x512xbf16>
    %59 = vector.shape_cast %58 : vector<1x1x512xbf16> to vector<1x512xbf16>
    %60 = arith.extf %59 : vector<1x512xbf16> to vector<1x512xf32>
    %61 = arith.extf %57 : vector<8x512xbf16> to vector<8x512xf32>
    %62 = vector.broadcast %60 : vector<1x512xf32> to vector<8x512xf32>
    %63 = arith.mulf %61, %62 : vector<8x512xf32>
    %cst_34 = arith.constant dense<0.000000e+00> : vector<8xf32>
    %64 = vector.multi_reduction <add>, %63, %cst_34 [1] : vector<8x512xf32> to vector<8xf32>
    %65 = vector.shape_cast %64 : vector<8xf32> to vector<8x1xf32>
    %66 = arith.addf %55, %65 : vector<8x1xf32>
    %c0_35 = arith.constant 0 : index
    %c8 = arith.constant 8 : index
    %c0_36 = arith.constant 0 : index
    %67 = vector.load %arg2[%c0_35, %c8, %c0_36] : memref<1x18x512xbf16, #tpu.memory_space<vmem>>, vector<1x8x512xbf16>
    %68 = vector.shape_cast %67 : vector<1x8x512xbf16> to vector<8x512xbf16>
    %c6_37 = arith.constant 6 : index
    %c0_38 = arith.constant 0 : index
    %c0_39 = arith.constant 0 : index
    %69 = vector.load %arg3[%c6_37, %c0_38, %c0_39] : memref<9x1x512xbf16, #tpu.memory_space<vmem>>, vector<1x1x512xbf16>
    %70 = vector.shape_cast %69 : vector<1x1x512xbf16> to vector<1x512xbf16>
    %71 = arith.extf %70 : vector<1x512xbf16> to vector<1x512xf32>
    %72 = arith.extf %68 : vector<8x512xbf16> to vector<8x512xf32>
    %73 = vector.broadcast %71 : vector<1x512xf32> to vector<8x512xf32>
    %74 = arith.mulf %72, %73 : vector<8x512xf32>
    %cst_40 = arith.constant dense<0.000000e+00> : vector<8xf32>
    %75 = vector.multi_reduction <add>, %74, %cst_40 [1] : vector<8x512xf32> to vector<8xf32>
    %76 = vector.shape_cast %75 : vector<8xf32> to vector<8x1xf32>
    %77 = arith.addf %66, %76 : vector<8x1xf32>
    %c0_41 = arith.constant 0 : index
    %c9 = arith.constant 9 : index
    %c0_42 = arith.constant 0 : index
    %78 = vector.load %arg2[%c0_41, %c9, %c0_42] : memref<1x18x512xbf16, #tpu.memory_space<vmem>>, vector<1x8x512xbf16>
    %79 = vector.shape_cast %78 : vector<1x8x512xbf16> to vector<8x512xbf16>
    %c7 = arith.constant 7 : index
    %c0_43 = arith.constant 0 : index
    %c0_44 = arith.constant 0 : index
    %80 = vector.load %arg3[%c7, %c0_43, %c0_44] : memref<9x1x512xbf16, #tpu.memory_space<vmem>>, vector<1x1x512xbf16>
    %81 = vector.shape_cast %80 : vector<1x1x512xbf16> to vector<1x512xbf16>
    %82 = arith.extf %81 : vector<1x512xbf16> to vector<1x512xf32>
    %83 = arith.extf %79 : vector<8x512xbf16> to vector<8x512xf32>
    %84 = vector.broadcast %82 : vector<1x512xf32> to vector<8x512xf32>
    %85 = arith.mulf %83, %84 : vector<8x512xf32>
    %cst_45 = arith.constant dense<0.000000e+00> : vector<8xf32>
    %86 = vector.multi_reduction <add>, %85, %cst_45 [1] : vector<8x512xf32> to vector<8xf32>
    %87 = vector.shape_cast %86 : vector<8xf32> to vector<8x1xf32>
    %88 = arith.addf %77, %87 : vector<8x1xf32>
    %c0_46 = arith.constant 0 : index
    %c10 = arith.constant 10 : index
    %c0_47 = arith.constant 0 : index
    %89 = vector.load %arg2[%c0_46, %c10, %c0_47] : memref<1x18x512xbf16, #tpu.memory_space<vmem>>, vector<1x8x512xbf16>
    %90 = vector.shape_cast %89 : vector<1x8x512xbf16> to vector<8x512xbf16>
    %c8_48 = arith.constant 8 : index
    %c0_49 = arith.constant 0 : index
    %c0_50 = arith.constant 0 : index
    %91 = vector.load %arg3[%c8_48, %c0_49, %c0_50] : memref<9x1x512xbf16, #tpu.memory_space<vmem>>, vector<1x1x512xbf16>
    %92 = vector.shape_cast %91 : vector<1x1x512xbf16> to vector<1x512xbf16>
    %93 = arith.extf %92 : vector<1x512xbf16> to vector<1x512xf32>
    %94 = arith.extf %90 : vector<8x512xbf16> to vector<8x512xf32>
    %95 = vector.broadcast %93 : vector<1x512xf32> to vector<8x512xf32>
    %96 = arith.mulf %94, %95 : vector<8x512xf32>
    %cst_51 = arith.constant dense<0.000000e+00> : vector<8xf32>
    %97 = vector.multi_reduction <add>, %96, %cst_51 [1] : vector<8x512xf32> to vector<8xf32>
    %98 = vector.shape_cast %97 : vector<8xf32> to vector<8x1xf32>
    %99 = arith.addf %88, %98 : vector<8x1xf32>
    %c0_52 = arith.constant 0 : index
    %c0_53 = arith.constant 0 : index
    %100 = vector.load %arg4[%c0_52, %c0_53] : memref<1x1xf32, #tpu.memory_space<vmem>>, vector<1x1xf32>
    %101 = vector.broadcast %100 : vector<1x1xf32> to vector<8x1xf32>
    %102 = arith.addf %99, %101 : vector<8x1xf32>
    %c0_54 = arith.constant 0 : index
    %c0_55 = arith.constant 0 : index
    %c0_56 = arith.constant 0 : index
    %103 = vector.load %arg5[%c0_54, %c0_55, %c0_56] : memref<1x8x1xf32, #tpu.memory_space<vmem>>, vector<1x8x1xf32>
    %104 = vector.shape_cast %103 : vector<1x8x1xf32> to vector<8x1xf32>
    %105 = vector.shape_cast %102 : vector<8x1xf32> to vector<1x8x1xf32>
    tpu.vector_store %arg5[%c0_54, %c0_55, %c0_56], %105 {strides = array<i32>} : memref<1x8x1xf32, #tpu.memory_space<vmem>>, vector<1x8x1xf32>,
    return
  }
  func.func @transform_0(%arg0: i32, %arg1: i32) -> (i32, i32, i32) {
    %c0_i32 = arith.constant 0 : i32
    %c0_i32_0 = arith.constant 0 : i32
    %c0_i32_1 = arith.constant 0 : i32
    return %arg1, %c0_i32, %c0_i32_0 : i32, i32, i32
  }
  func.func @transform_1(%arg0: i32, %arg1: i32) -> (i32, i32, i32) {
    %c0_i32 = arith.constant 0 : i32
    %c0_i32_0 = arith.constant 0 : i32
    %c0_i32_1 = arith.constant 0 : i32
    %c0_i32_2 = arith.constant 0 : i32
    return %c0_i32, %c0_i32_0, %c0_i32_1 : i32, i32, i32
  }
  func.func @transform_2(%arg0: i32, %arg1: i32) -> (i32, i32) {
    %c0_i32 = arith.constant 0 : i32
    %c0_i32_0 = arith.constant 0 : i32
    return %c0_i32, %arg0 : i32, i32
  }
  func.func @transform_3(%arg0: i32, %arg1: i32) -> (i32, i32, i32) {
    %c0_i32 = arith.constant 0 : i32
    %c0_i32_0 = arith.constant 0 : i32
    return %arg1, %c0_i32, %arg0 : i32, i32, i32
  }
}

</mosaic_0001>

<bundles_post_ra>
// kernel: sgan_discriminator_forward.4
= control target key start
LH: loop header
LB: loop body
LE: loop exit
PB: predicated region body
PF: predicated region fallthrough
CT: control target
= control target key end

     0   :  { %s697_s12 = smov 0   ;;  %s699_s13 = smov 0   ;;  %s777_s0 = inlined_call_operand.vmem [shape: bf16[2,64,80], index: 0, kind: input, shape index: {}]   ;;  %s778_s1 = inlined_call_operand.vmem [shape: bf16[80,64], index: 1, kind: input, shape index: {}]   ;;  %s779_s2 = inlined_call_operand.vmem [shape: f32[1,64], index: 2, kind: input, shape index: {}]   ;;  %s780_s3 = inlined_call_operand.vmem [shape: bf16[2,64,64], index: 3, kind: output, shape index: {}]  }
   0x1   :  { %s701_s14 = smov 0  }
   0x2 LB: > { %s22_s15 = sadd.s32 1, %s671_s13  ;;  %p544_p0 = scmp.ge.s32.totalorder %s675_s14, 1  ;;  %s675_s14 = sphi %s701_s14, %s13_s14   ;;  %s671_s13 = sphi %s699_s13, %s782_s13   ;;  %s667_s12 = sphi %s697_s12, %s781_s12  }
   0x3   : > { %p23_p1 = scmp.ge.s32.totalorder %s22_s15, 2  ;;  %p168_p2 = scmp.lt.s32.totalorder %s675_s14, 3 }
   0x5   : > { %s784_s15 = smov (%p23_p1, %s22_s15), 0  ;;  %p169_p3 = pnand %p544_p0, %p168_p2 }
   0x6   : > { %p202_p4 = scmp.lt.s32.totalorder (!%p169_p3), %s667_s12, 1 }
   0x7   : > { %172 = sbr.rel (%p169_p3) target bundleno = 242 (0xf2), region = 32 }
   0xc   : > { %v644_v0 = vld [vmem:[%s778_s1 + $0x20] sm:$0xff]   ;;  %v645_v1 = vld [vmem:[%s778_s1 + $0x18] sm:$0xff]   ;;  %s786_s12 = smov (!%p202_p4, %s667_s12), 1  ;;  %v646_v2 = vld [vmem:[%s778_s1 + $0x10] sm:$0xff]   ;;  %vm298_vm0 = vcmask 654336   ;;  %vm424_vm1 = vcmask 519168  }
   0xd   : > { %592 = vmatprep.subr.bf16.mxu0 %v644_v0  ;;  %610 = vmatprep.subr.bf16.mxu1 %v644_v0  ;;  %s573_s22 = sshll.u32 %s786_s12, 5  ;;  %v647_v5 = vld [vmem:[%s778_s1 + $0x8] sm:$0xff]   ;;  %v648_v6 = vld [vmem:[%s778_s1] sm:$0xff]  }
   0xe   : > { %593 = vmatpush3.bf16.msra.mxu0 %v644_v0  ;;  %615 = vmatpush3.bf16.msra.mxu1 %v644_v0  ;;  %s206_s25 = scalar_lea.vmem %s777_s0, %s573_s22  ;;  %v549_v9 = vld [vmem:[%s779_s2] ss:$0 sm:$0xff]  ;;  %s750_s7 = scalar_lea.vmem %s780_s3, %s573_s22 }
   0xf   : > { %594 = vmatprep.subr.bf16.mxu0 %v645_v1  ;;  %611 = vmatprep.subr.bf16.mxu1 %v645_v1  ;;  %v649_v3 = vld [vmem:[%s206_s25] sm:$0xff]   ;;  %v650_v4 = vld [vmem:[%s206_s25 + $0x10] sm:$0xff]   ;;  %v651_v7 = vld [vmem:[%s206_s25 + $0x8] sm:$0xff]  }
  0x10   : > { %602 = vmatprep.mubr.msk.bf16.mxu0 %vm298_vm0, %v649_v3  ;;  %606 = vmatprep.mubr.msk.bf16.mxu1 %vm298_vm0, %v650_v4  ;;  %v652_v8 = vld [vmem:[%s206_s25 + $0x18] sm:$0xff]  }
  0x12   : > { %595 = vmatpush3.bf16.msra.mxu0 %v645_v1  ;;  %616 = vmatpush3.bf16.msra.mxu1 %v645_v1 }
  0x13   : > { %596 = vmatprep.subr.bf16.mxu0 %v646_v2  ;;  %612 = vmatprep.subr.bf16.mxu1 %v646_v2 }
  0x16   : > { %597 = vmatpush3.bf16.msra.mxu0 %v646_v2  ;;  %617 = vmatpush3.bf16.msra.mxu1 %v646_v2 }
  0x17   : > { %598 = vmatprep.subr.bf16.mxu0 %v647_v5  ;;  %613 = vmatprep.subr.bf16.mxu1 %v647_v5 }
  0x1a   : > { %599 = vmatpush3.bf16.msra.mxu0 %v647_v5  ;;  %618 = vmatpush3.bf16.msra.mxu1 %v647_v5 }
  0x1b   : > { %600 = vmatprep.subr.bf16.mxu0 %v648_v6  ;;  %614 = vmatprep.subr.bf16.mxu1 %v648_v6 }
  0x1e   : > { %601 = vmatpush3.bf16.msra.mxu0 %v648_v6  ;;  %619 = vmatpush3.bf16.msra.mxu1 %v648_v6 }
  0x21   : > { %603 = vmatmul.mubr.msk.bf16.vlgmr.msra.gmra.mxu0 %vm298_vm0, %v651_v7  ;;  %607 = vmatmul.mubr.msk.bf16.vlgmr.msra.gmra.mxu1 %vm298_vm0, %v652_v8 }
  0xe1   : > { %v604_v10 = vpop.f32.mrf.mxu0  ;;  %v608_v11 = vpop.f32.mrf.mxu1 }
  0xe2   : > { %v354_v12 = vadd.f32 %v604_v10, %v549_v9  ;;  %v370_v13 = vadd.f32 %v608_v11, %v549_v9 }
  0xe3   : > { %v345_v14 = vpop.f32.mrf.mxu0  ;;  %v361_v15 = vpop.f32.mrf.mxu1 }
  0xe4   : > { %v378_v16 = vmul.f32 0.2, %v354_v12  ;;  %v382_v17 = vmul.f32 0.2, %v370_v13  ;;  %v346_v18 = vadd.f32 %v549_v9, %v345_v14  ;;  %v362_v19 = vadd.f32 %v549_v9, %v361_v15 }
  0xe5   : > { %v605_v20 = vpop.f32.mrf.mxu0  ;;  %v609_v21 = vpop.f32.mrf.mxu1 }
  0xe6   : > { %v386_v22 = vmax.f32 %v354_v12, %v378_v16  ;;  %v390_v23 = vmax.f32 %v370_v13, %v382_v17  ;;  %v376_v24 = vmul.f32 0.2, %v346_v18  ;;  %v380_v25 = vmul.f32 0.2, %v362_v19 }
  0xe7   : > { %v357_v26 = vadd.f32 %v605_v20, %v549_v9  ;;  %v373_v27 = vadd.f32 %v609_v21, %v549_v9  ;;  %v348_v28 = vpop.f32.mrf.mxu0  ;;  %v364_v29 = vpop.f32.mrf.mxu1 }
  0xe8   : > { %v577_v30 = vpack.c.bf16 %v386_v22, %v386_v22  ;;  %v581_v31 = vpack.c.bf16 %v390_v23, %v390_v23  ;;  %v384_v32 = vmax.f32 %v346_v18, %v376_v24  ;;  %v388_v33 = vmax.f32 %v362_v19, %v380_v25 }
  0xe9   : > { %v379_v34 = vmul.f32 0.2, %v357_v26  ;;  %v383_v35 = vmul.f32 0.2, %v373_v27  ;;  %v349_v36 = vadd.f32 %v549_v9, %v348_v28  ;;  %v365_v37 = vadd.f32 %v549_v9, %v364_v29 }
  0xea   : > { %427 = vst.msk [vmem:[%s750_s7 + $0x8] sm:$0xf] %vm424_vm1, %v577_v30  ;;  %431 = vst.msk [vmem:[%s750_s7 + $0x18] sm:$0xf] %vm424_vm1, %v581_v31  ;;  %v575_v38 = vpack.c.bf16 %v384_v32, %v384_v32  ;;  %v579_v39 = vpack.c.bf16 %v388_v33, %v388_v33 }
  0xeb   : > { %v387_v40 = vmax.f32 %v357_v26, %v379_v34  ;;  %v391_v41 = vmax.f32 %v373_v27, %v383_v35  ;;  %v377_v42 = vmul.f32 0.2, %v349_v36  ;;  %v381_v43 = vmul.f32 0.2, %v365_v37 }
  0xec   : > { %425 = vst.msk [vmem:[%s750_s7] sm:$0xf] %vm424_vm1, %v575_v38  ;;  %429 = vst.msk [vmem:[%s750_s7 + $0x10] sm:$0xf] %vm424_vm1, %v579_v39 }
  0xed   : > { %v578_v44 = vpack.c.bf16 %v387_v40, %v387_v40  ;;  %v582_v45 = vpack.c.bf16 %v391_v41, %v391_v41  ;;  %v385_v46 = vmax.f32 %v349_v36, %v377_v42  ;;  %v389_v47 = vmax.f32 %v365_v37, %v381_v43 }
  0xef   : > { %428 = vst.msk [vmem:[%s750_s7 + $0xc] sm:$0xf] %vm424_vm1, %v578_v44  ;;  %432 = vst.msk [vmem:[%s750_s7 + $0x1c] sm:$0xf] %vm424_vm1, %v582_v45  ;;  %v576_v48 = vpack.c.bf16 %v385_v46, %v385_v46  ;;  %v580_v49 = vpack.c.bf16 %v389_v47, %v389_v47 }
  0xf1   : > { %426 = vst.msk [vmem:[%s750_s7 + $0x4] sm:$0xf] %vm424_vm1, %v576_v48  ;;  %430 = vst.msk [vmem:[%s750_s7 + $0x14] sm:$0xf] %vm424_vm1, %v580_v49 }
  0xf2 PF: > { %s13_s14 = sadd.s32 1, %s675_s14   ;;  %s781_s12 = smov %s671_s13 }
  0xf3   : > { %p10_p5 = scmp.ge.s32.totalorder %s13_s14, 4   ;;  %s782_s13 = smov %s784_s15 }
  0xf5   :  { %12 = sbr.rel (!%p10_p5) target bundleno = 2 (0x2), region = 68 }

// kernel: sgan_discriminator_forward.6
= control target key start
LH: loop header
LB: loop body
LE: loop exit
PB: predicated region body
PF: predicated region fallthrough
CT: control target
= control target key end

     0   :  { %s440_s12 = smov 0   ;;  %s442_s13 = smov 0   ;;  %s479_s0 = inlined_call_operand.vmem [shape: bf16[2,24,128], index: 0, kind: input, shape index: {}]   ;;  %s480_s1 = inlined_call_operand.vmem [shape: f32[1,128], index: 1, kind: input, shape index: {}]   ;;  %s481_s2 = inlined_call_operand.vmem [shape: f32[1,128], index: 2, kind: input, shape index: {}]   ;;  %s482_s3 = inlined_call_operand.vmem [shape: bf16[2,24,128], index: 3, kind: output, shape index: {}]  }
   0x1   :  { %s444_s14 = smov 0  }
   0x2 LB: > { %s25_s15 = sadd.s32 1, %s414_s13  ;;  %p349_p0 = scmp.ge.s32.totalorder %s418_s14, 1  ;;  %s418_s14 = sphi %s444_s14, %s13_s14   ;;  %s414_s13 = sphi %s442_s13, %s484_s13   ;;  %s410_s12 = sphi %s440_s12, %s483_s12  }
   0x3   : > { %p27_p1 = scmp.ge.s32.totalorder %s25_s15, 2  ;;  %p158_p2 = scmp.lt.s32.totalorder %s418_s14, 3 }
   0x5   : > { %s486_s15 = smov (%p27_p1, %s25_s15), 0  ;;  %p159_p3 = pnand %p349_p0, %p158_p2 }
   0x6   : > { %p191_p4 = scmp.lt.s32.totalorder (!%p159_p3), %s410_s12, 1 }
   0x7   : > { %162 = sbr.rel (%p159_p3) target bundleno = 30 (0x1e), region = 32 }
   0xc   : > { %s488_s12 = smov (!%p191_p4, %s410_s12), 1  ;;  %v352_v2 = vld [vmem:[%s480_s1] ss:$0 sm:$0xff] }
   0xd   : > { %s371_s16 = smul.u32 12, %s488_s12  ;;  %v353_v6 = vld [vmem:[%s481_s2] ss:$0 sm:$0xff] }
   0xf   : > { %s198_s19 = scalar_lea.vmem %s479_s0, %s371_s16  ;;  %s208_s26 = scalar_lea.vmem %s482_s3, %s371_s16 }
  0x10   : > { %v363_v0 = vld [vmem:[%s198_s19] sm:$0xff]   ;;  %v212_v1 = vld [vmem:[%s198_s19 + $0x8] sm:$0xf] }
  0x11   : > { %v364_v3 = vunpack.c.l.bf16 %v363_v0  ;;  %v365_v4 = vunpack.c.h.bf16 %v363_v0  ;;  %v215_v5 = vunpack.c.l.bf16 %v212_v1 }
  0x13   : > { %v223_v7 = vmul.f32 %v364_v3, %v352_v2  ;;  %v224_v8 = vmul.f32 %v365_v4, %v352_v2  ;;  %v225_v9 = vmul.f32 %v352_v2, %v215_v5 }
  0x15   : > { %v233_v10 = vadd.f32 %v353_v6, %v223_v7  ;;  %v234_v11 = vadd.f32 %v353_v6, %v224_v8  ;;  %v235_v12 = vadd.f32 %v353_v6, %v225_v9 }
  0x17   : > { %v236_v13 = vmul.f32 0.2, %v233_v10  ;;  %v237_v14 = vmul.f32 0.2, %v234_v11  ;;  %v238_v15 = vmul.f32 0.2, %v235_v12 }
  0x19   : > { %v239_v16 = vmax.f32 %v233_v10, %v236_v13  ;;  %v240_v17 = vmax.f32 %v234_v11, %v237_v14  ;;  %v241_v18 = vmax.f32 %v235_v12, %v238_v15 }
  0x1b   : > { %v369_v19 = vpack.c.bf16 %v240_v17, %v239_v16  ;;  %v361_v20 = vpack.c.bf16 %v241_v18, %v241_v18 }
  0x1d   : > { %370 = vst [vmem:[%s208_s26] sm:$0xff] %v369_v19   ;;  %257 = vst [vmem:[%s208_s26 + $0x8] sm:$0xf] %v361_v20 }
  0x1e PF: > { %s13_s14 = sadd.s32 1, %s418_s14   ;;  %s483_s12 = smov %s414_s13 }
  0x1f   : > { %p10_p5 = scmp.ge.s32.totalorder %s13_s14, 4   ;;  %s484_s13 = smov %s486_s15 }
  0x21   :  { %12 = sbr.rel (!%p10_p5) target bundleno = 2 (0x2), region = 62 }

// kernel: sgan_discriminator_forward.5
= control target key start
LH: loop header
LB: loop body
LE: loop exit
PB: predicated region body
PF: predicated region fallthrough
CT: control target
= control target key end

     0   :  { %s3363_s15 = smov 0   ;;  %s3365_s16 = smov 0   ;;  %s3971_s0 = inlined_call_operand.vmem [shape: bf16[2,38,256], index: 0, kind: input, shape index: {}]   ;;  %s3972_s1 = inlined_call_operand.vmem [shape: bf16[9,256,128], index: 1, kind: input, shape index: {}]   ;;  %s3973_s2 = inlined_call_operand.vmem [shape: f32[1,128], index: 2, kind: input, shape index: {}]   ;;  %s3974_s3 = inlined_call_operand.vmem [shape: bf16[2,24,128], index: 3, kind: output, shape index: {0}]   ;;  %s3975_s4 = inlined_call_operand.vmem [shape: f32[2,2,128], index: 4, kind: output, shape index: {1}]  }
   0x1   :  { %s3367_s17 = smov 0  }
   0x2 LB: > { %s24_s18 = sadd.s32 1, %s3331_s16  ;;  %p2394_p0 = scmp.ge.s32.totalorder %s3335_s17, 1  ;;  %s3335_s17 = sphi %s3367_s17, %s15_s17   ;;  %s3331_s16 = sphi %s3365_s16, %s3983_s16   ;;  %s3327_s15 = sphi %s3363_s15, %s3982_s15  }
   0x3   : > { %p25_p1 = scmp.ge.s32.totalorder %s24_s18, 2  ;;  %p198_p2 = scmp.lt.s32.totalorder %s3335_s17, 3 }
   0x5   : > { %s3985_s18 = smov (%p25_p1, %s24_s18), 0  ;;  %p199_p3 = pnand %p2394_p0, %p198_p2 }
   0x6   : > { %p241_p4 = scmp.lt.s32.totalorder (!%p199_p3), %s3327_s15, 1 }
   0x7   : > { %202 = sbr.rel (%p199_p3) target bundleno = 400 (0x190), region = 32 }
   0xc   : > { %v3142_v0 = vld [vmem:[%s3972_s1 + $0xf8] sm:$0xff]   ;;  %v3146_v4 = vld [vmem:[%s3972_s1 + $0xf0] sm:$0xff]   ;;  %v3150_v8 = vld [vmem:[%s3972_s1 + $0xe8] sm:$0xff]   ;;  %s3987_s15 = smov (!%p241_p4, %s3327_s15), 1  ;;  %vm354_vm0 = vsmask.f32 7424 }
   0xd   : > { %v3143_v1 = vld [vmem:[%s3972_s1 + $0x78] sm:$0xff]   ;;  %2841 = vmatprep.subr.bf16.mxu0 %v3142_v0  ;;  %v3147_v5 = vld [vmem:[%s3972_s1 + $0x70] sm:$0xff]   ;;  %v3151_v9 = vld [vmem:[%s3972_s1 + $0x68] sm:$0xff]   ;;  %s3109_s27 = smul.u32 40, %s3987_s15  ;;  %vm722_vm1 = vcmask 1046528   ;;  %vm925_vm2 = vcmask 1044480  }
   0xe   : > { %v3144_v2 = vld [vmem:[%s3972_s1 + $0xb8] sm:$0xff]   ;;  %2869 = vmatprep.subr.bf16.mxu1 %v3143_v1  ;;  %v3148_v6 = vld [vmem:[%s3972_s1 + $0xb0] sm:$0xff]   ;;  %v3152_v10 = vld [vmem:[%s3972_s1 + $0xa8] sm:$0xff]   ;;  %vm1122_vm3 = vsmask.f32 4352  ;;  %vm1549_vm4 = vcmask 1045504  }
   0xf   : > { %v3145_v3 = vld [vmem:[%s3972_s1 + $0x38] sm:$0xff]   ;;  %2842 = vmatpush3.bf16.msra.mxu0 %v3144_v2  ;;  %v3149_v7 = vld [vmem:[%s3972_s1 + $0x30] sm:$0xff]   ;;  %v3153_v11 = vld [vmem:[%s3972_s1 + $0x28] sm:$0xff]   ;;  %s3481_s12 = scalar_lea.vmem %s3971_s0, %s3109_s27  ;;  %vm1746_vm5 = vsmask.f32 5376  ;;  %s3110_s10 = smul.u32 12, %s3987_s15 }
  0x10   : > { %2870 = vmatpush3.bf16.msra.mxu1 %v3145_v3  ;;  %2843 = vmatprep.subr.bf16.mxu0 %v3146_v4  ;;  %v3154_v12 = vld [vmem:[%s3972_s1 + $0xe0] sm:$0xff]   ;;  %v3158_v16 = vld [vmem:[%s3972_s1 + $0xd8] sm:$0xff]   ;;  %v3162_v20 = vld [vmem:[%s3972_s1 + $0xd0] sm:$0xff]   ;;  %s2397_s19 = sshll.u32 %s3987_s15, 1 }
  0x11   : > { %2871 = vmatprep.subr.bf16.mxu1 %v3147_v5  ;;  %v3155_v13 = vld [vmem:[%s3972_s1 + $0x60] sm:$0xff]   ;;  %v3159_v17 = vld [vmem:[%s3972_s1 + $0x58] sm:$0xff]   ;;  %v3163_v21 = vld [vmem:[%s3972_s1 + $0x50] sm:$0xff]   ;;  %s260_s14 = scalar_lea.vmem %s3974_s3, %s3110_s10  ;;  %s267_s22 = scalar_lea.vmem %s3975_s4, %s2397_s19 }
  0x12   : > { %v3156_v14 = vld [vmem:[%s3972_s1 + $0xa0] sm:$0xff]   ;;  %v3160_v18 = vld [vmem:[%s3972_s1 + $0x98] sm:$0xff]   ;;  %v3164_v22 = vld [vmem:[%s3972_s1 + $0x90] sm:$0xff]  }
  0x13   : > { %2844 = vmatpush3.bf16.msra.mxu0 %v3148_v6  ;;  %v3157_v15 = vld [vmem:[%s3972_s1 + $0x20] sm:$0xff]   ;;  %v3161_v19 = vld [vmem:[%s3972_s1 + $0x18] sm:$0xff]   ;;  %v3165_v23 = vld [vmem:[%s3972_s1 + $0x10] sm:$0xff]  }
  0x14   : > { %2872 = vmatpush3.bf16.msra.mxu1 %v3149_v7  ;;  %2845 = vmatprep.subr.bf16.mxu0 %v3150_v8  ;;  %v3166_v24 = vld [vmem:[%s3972_s1 + $0xc8] sm:$0xff]   ;;  %v3170_v28 = vld [vmem:[%s3972_s1 + $0xc0] sm:$0xff]   ;;  %v3494_v34 = vld [vmem:[%s3481_s12 + $0x10] sm:$0xff] }
  0x15   : > { %2873 = vmatprep.subr.bf16.mxu1 %v3151_v9  ;;  %v3167_v25 = vld [vmem:[%s3972_s1 + $0x48] sm:$0xff]   ;;  %v3171_v29 = vld [vmem:[%s3972_s1 + $0x40] sm:$0xff]   ;;  %v304_v35 = vld [vmem:[%s3481_s12 + $0x18] sm:$0x11]  ;;  %v2451_v38 = vcombine.high %v3494_v34, %v3494_v34  ;;  %v2450_v0 = vcombine.low %v3494_v34, %v3494_v34 }
  0x16   : > { %v3168_v26 = vld [vmem:[%s3972_s1 + $0x88] sm:$0xff]   ;;  %v3172_v30 = vld [vmem:[%s3972_s1 + $0x80] sm:$0xff]   ;;  %v3502_v39 = vcombine.high %v3494_v34, %v304_v35  ;;  %v3505_v40 = vcombine.low %v3494_v34, %v304_v35  ;;  %v3178_v41 = vld [vmem:[%s3972_s1 + $0x178] sm:$0xff]  }
  0x17   : > { %2846 = vmatpush3.bf16.msra.mxu0 %v3152_v10  ;;  %v3169_v27 = vld [vmem:[%s3972_s1 + $0x8] sm:$0xff]   ;;  %v3173_v31 = vld [vmem:[%s3972_s1] sm:$0xff]   ;;  %v3179_v46 = vld [vmem:[%s3972_s1 + $0x1f8] sm:$0xff]  }
  0x18   : > { %2874 = vmatpush3.bf16.msra.mxu1 %v3153_v11  ;;  %2847 = vmatprep.subr.bf16.mxu0 %v3154_v12  ;;  %v269_v32 = vld [vmem:[%s3481_s12] sm:$0xff]  ;;  %v3491_v33 = vld [vmem:[%s3481_s12 + $0x8] sm:$0xff]  ;;  %v375_v47 = vshll.u32 %v3502_v39, 16  ;;  %v363_v48 = vshll.u32 %v3505_v40, 16  ;;  %v3180_v53 = vld [vmem:[%s3972_s1 + $0x138] sm:$0xff]   ;;  %v382_v58 = vshrl.u32 %v3502_v39, 16 }
  0x19   : > { %2875 = vmatprep.subr.bf16.mxu1 %v3155_v13  ;;  %v2431_v36 = vcombine.high %v269_v32, %v3491_v33  ;;  %v2430_v37 = vcombine.low %v269_v32, %v3491_v33  ;;  %v3181_v54 = vld [vmem:[%s3972_s1 + $0x1b8] sm:$0xff]   ;;  %v3183_v57 = vld [vmem:[%s3972_s1 + $0x1f0] sm:$0xff]   ;;  %v379_v2 = vshrl.u32 %v3505_v40, 16  ;;  %v3187_v3 = vld [vmem:[%s3972_s1 + $0x1e8] sm:$0xff]  }
  0x1a   : > { %v377_v51 = vrot.slane %v375_v47, 1  ;;  %v365_v52 = vrot.slane %v363_v48, 1  ;;  %v3182_v61 = vld [vmem:[%s3972_s1 + $0x170] sm:$0xff]   ;;  %v3186_v4 = vld [vmem:[%s3972_s1 + $0x168] sm:$0xff]   ;;  %v3191_v8 = vld [vmem:[%s3972_s1 + $0x1e0] sm:$0xff]  }
  0x1b   : > { %2848 = vmatpush3.bf16.msra.mxu0 %v3156_v14  ;;  %v368_v42 = vshrl.u32 %v2431_v36, 16  ;;  %v370_v43 = vshll.u32 %v2431_v36, 16  ;;  %667 = vmatprep.mubr.bf16.mxu1 %v2431_v36  ;;  %v356_v44 = vshrl.u32 %v2430_v37, 16  ;;  %v358_v45 = vshll.u32 %v2430_v37, 16  ;;  %v3185_v62 = vld [vmem:[%s3972_s1 + $0x1b0] sm:$0xff]   ;;  %v3189_v5 = vld [vmem:[%s3972_s1 + $0x1a8] sm:$0xff]  }
  0x1c   : > { %2876 = vmatpush3.bf16.msra.mxu1 %v3157_v15  ;;  %2849 = vmatprep.subr.bf16.mxu0 %v3158_v16  ;;  %v384_v63 = vor.u32 %v382_v58, %v377_v51  ;;  %v3184_v1 = vld [vmem:[%s3972_s1 + $0x130] sm:$0xff]   ;;  %v3188_v6 = vld [vmem:[%s3972_s1 + $0x128] sm:$0xff]   ;;  %v381_v7 = vor.u32 %v379_v2, %v365_v52  ;;  %v3190_v9 = vld [vmem:[%s3972_s1 + $0x160] sm:$0xff]  }
  0x1d   : > { %2877 = vmatprep.subr.bf16.mxu1 %v3159_v17  ;;  %v372_v49 = vrot.slane %v370_v43, 1  ;;  %v360_v50 = vrot.slane %v358_v45, 1  ;;  %v3193_v10 = vld [vmem:[%s3972_s1 + $0x1a0] sm:$0xff]   ;;  %v3195_v12 = vld [vmem:[%s3972_s1 + $0x1d8] sm:$0xff]   ;;  %v3199_v16 = vld [vmem:[%s3972_s1 + $0x1d0] sm:$0xff]  }
  0x1e   : > { %v3192_v11 = vld [vmem:[%s3972_s1 + $0x120] sm:$0xff]   ;;  %v3194_v13 = vld [vmem:[%s3972_s1 + $0x158] sm:$0xff]   ;;  %v3198_v17 = vld [vmem:[%s3972_s1 + $0x150] sm:$0xff]  }
  0x1f   : > { %2850 = vmatpush3.bf16.msra.mxu0 %v3160_v18  ;;  %v373_v55 = vor.u32 %v372_v49, %v368_v42  ;;  %v361_v56 = vor.u32 %v360_v50, %v356_v44  ;;  %v3197_v14 = vld [vmem:[%s3972_s1 + $0x198] sm:$0xff]   ;;  %v3201_v18 = vld [vmem:[%s3972_s1 + $0x190] sm:$0xff]   ;;  %v3232_v2 = vld [vmem:[%s3972_s1 + $0x220] sm:$0xff]  }
  0x20   : > { %2878 = vmatpush3.bf16.msra.mxu1 %v3161_v19  ;;  %2851 = vmatprep.subr.bf16.mxu0 %v3162_v20  ;;  %v3196_v15 = vld [vmem:[%s3972_s1 + $0x118] sm:$0xff]   ;;  %v3200_v19 = vld [vmem:[%s3972_s1 + $0x110] sm:$0xff]   ;;  %v3205_v20 = vld [vmem:[%s3972_s1 + $0x1c8] sm:$0xff]  }
  0x21   : > { %2879 = vmatprep.subr.bf16.mxu1 %v3163_v21  ;;  %v378_v59 = vsel %vm354_vm0, %v373_v55, %v377_v51  ;;  %v366_v60 = vsel %vm354_vm0, %v361_v56, %v365_v52  ;;  %v3204_v21 = vld [vmem:[%s3972_s1 + $0x148] sm:$0xff]   ;;  %v881_v32 = vld [vmem:[%s3481_s12 + $0x18] sm:$0x77]  ;;  %v3222_v55 = vld [vmem:[%s3972_s1 + $0x270] sm:$0xff]  }
  0x22   : > { %517 = vmatprep.mubr.bf16.mxu0 %v378_v59  ;;  %v3218_v45 = vld [vmem:[%s3972_s1 + $0x278] sm:$0xff]   ;;  %v3223_v56 = vld [vmem:[%s3972_s1 + $0x2f0] sm:$0xff]   ;;  %v3226_v59 = vld [vmem:[%s3972_s1 + $0x268] sm:$0xff]  }
  0x23   : > { %2852 = vmatpush3.bf16.msra.mxu0 %v3164_v22  ;;  %v3207_v22 = vld [vmem:[%s3972_s1 + $0x188] sm:$0xff]   ;;  %v3220_v49 = vld [vmem:[%s3972_s1 + $0x238] sm:$0xff]   ;;  %v3225_v58 = vld [vmem:[%s3972_s1 + $0x2b0] sm:$0xff]  }
  0x24   : > { %2880 = vmatpush3.bf16.msra.mxu1 %v3165_v23  ;;  %2853 = vmatprep.subr.bf16.mxu0 %v3166_v24  ;;  %v3206_v23 = vld [vmem:[%s3972_s1 + $0x108] sm:$0xff]   ;;  %v3209_v24 = vld [vmem:[%s3972_s1 + $0x1c0] sm:$0xff]   ;;  %v3221_v51 = vld [vmem:[%s3972_s1 + $0x2b8] sm:$0xff]  }
  0x25   : > { %2881 = vmatprep.subr.bf16.mxu1 %v3167_v25  ;;  %v3208_v25 = vld [vmem:[%s3972_s1 + $0x140] sm:$0xff]  }
  0x27   : > { %2854 = vmatpush3.bf16.msra.mxu0 %v3168_v26  ;;  %v3211_v26 = vld [vmem:[%s3972_s1 + $0x180] sm:$0xff]  }
  0x28   : > { %2882 = vmatpush3.bf16.msra.mxu1 %v3169_v27  ;;  %2855 = vmatprep.subr.bf16.mxu0 %v3170_v28  ;;  %v683_v27 = vld [vmem:[%s3481_s12] sm:$0xee]  ;;  %v727_v28 = vrot.slane %v3502_v39, 1  ;;  %v2552_v39 = vcombine.low %v3494_v34, %v881_v32 }
  0x29   : > { %2883 = vmatprep.subr.bf16.mxu1 %v3171_v29  ;;  %v880_v29 = vld [vmem:[%s3481_s12] sm:$0x88] }
  0x2a   : > { %v3615_v35 = vcombine.low %v880_v29, %v3491_v33  ;;  %v3618_v36 = vcombine.high %v880_v29, %v3491_v33  ;;  %v3253_v29 = vld [vmem:[%s3972_s1 + $0x378] sm:$0xff]  }
  0x2b   : > { %2856 = vmatpush3.bf16.msra.mxu0 %v3172_v30  ;;  %v2500_v30 = vcombine.low %v683_v27, %v3491_v33 }
  0x2c   : > { %2884 = vmatpush3.bf16.msra.mxu1 %v3173_v31  ;;  %2897 = vmatprep.subr.bf16.mxu0 %v3178_v41  ;;  %v2501_v31 = vcombine.high %v683_v27, %v3491_v33  ;;  %v2553_v41 = vcombine.high %v3494_v34, %v881_v32  ;;  %v929_v44 = vrot.slane %v3618_v36, 3  ;;  %v926_v47 = vrot.slane %v3615_v35, 3  ;;  %v3254_v32 = vld [vmem:[%s3972_s1 + $0x3f8] sm:$0xff]  }
  0x2d   : > { %2925 = vmatprep.subr.bf16.mxu1 %v3179_v46  ;;  %v723_v42 = vrot.slane %v2500_v30, 1  ;;  %v3219_v46 = vld [vmem:[%s3972_s1 + $0x2f8] sm:$0xff]  }
  0x2e   : > { %518 = vmatmul.mubr.bf16.vlgmr.msra.gmra.mxu0 %v366_v60  ;;  %v726_v43 = vrot.slane %v2501_v31, 1  ;;  %v930_v48 = vrot.slane %v2553_v41, 3  ;;  %v3227_v60 = vld [vmem:[%s3972_s1 + $0x2e8] sm:$0xff]  }
  0x2f   : > { %668 = vmatmul.mubr.bf16.vlgmr.msra.gmra.mxu1 %v2430_v37  ;;  %2898 = vmatpush3.bf16.msra.mxu0 %v3180_v53  ;;  %v3210_v37 = vld [vmem:[%s3972_s1 + $0x100] sm:$0xff]  }
  0x30   : > { %675 = vmatprep.mubr.bf16.mxu1 %v2451_v38  ;;  %2926 = vmatpush3.bf16.msra.mxu1 %v3181_v54  ;;  %v724_v38 = vrot.slane %v3505_v40, 1  ;;  %v927_v40 = vrot.slane %v2552_v39, 3  ;;  %v728_v50 = vsel %vm722_vm1, %v726_v43, %v727_v28  ;;  %v931_v53 = vsel %vm925_vm2, %v929_v44, %v930_v48 }
  0x31   : > { %2927 = vmatprep.subr.bf16.mxu1 %v3183_v57  ;;  %2899 = vmatprep.subr.bf16.mxu0 %v3182_v61  ;;  %v3224_v57 = vld [vmem:[%s3972_s1 + $0x230] sm:$0xff]   ;;  %v3228_v61 = vld [vmem:[%s3972_s1 + $0x228] sm:$0xff]  }
  0x32   : > { %525 = vmatprep.mubr.bf16.mxu0 %v384_v63  ;;  %v725_v52 = vsel %vm722_vm1, %v723_v42, %v724_v38  ;;  %v928_v54 = vsel %vm925_vm2, %v926_v47, %v927_v40  ;;  %v3230_v63 = vld [vmem:[%s3972_s1 + $0x260] sm:$0xff]   ;;  %v3257_v42 = vld [vmem:[%s3972_s1 + $0x3b8] sm:$0xff]  }
  0x33   : > { %2900 = vmatpush3.bf16.msra.mxu0 %v3184_v1  ;;  %v2653_v1 = vcombine.high %v3491_v33, %v3494_v34 }
  0x34   : > { %2928 = vmatpush3.bf16.msra.mxu1 %v3185_v62  ;;  %2901 = vmatprep.subr.bf16.mxu0 %v3186_v4  ;;  %v3229_v62 = vld [vmem:[%s3972_s1 + $0x2a8] sm:$0xff]   ;;  %v3234_v4 = vld [vmem:[%s3972_s1 + $0x258] sm:$0xff]  }
  0x35   : > { %2929 = vmatprep.subr.bf16.mxu1 %v3187_v3  ;;  %v3233_v3 = vld [vmem:[%s3972_s1 + $0x2a0] sm:$0xff]  }
  0x36   : > { %526 = vmatmul.mubr.bf16.gmra.mxu0 %v381_v7  ;;  %v3237_v7 = vld [vmem:[%s3972_s1 + $0x298] sm:$0xff]  }
  0x37   : > { %676 = vmatmul.mubr.bf16.gmra.mxu1 %v2450_v0  ;;  %2902 = vmatpush3.bf16.msra.mxu0 %v3188_v6  ;;  %v3231_v0 = vld [vmem:[%s3972_s1 + $0x2e0] sm:$0xff]   ;;  %v3236_v6 = vld [vmem:[%s3972_s1 + $0x218] sm:$0xff]  }
  0x38   : > { %2930 = vmatpush3.bf16.msra.mxu1 %v3189_v5  ;;  %2903 = vmatprep.subr.bf16.mxu0 %v3190_v9  ;;  %v3235_v5 = vld [vmem:[%s3972_s1 + $0x2d8] sm:$0xff]   ;;  %v3239_v9 = vld [vmem:[%s3972_s1 + $0x2d0] sm:$0xff]  }
  0x39   : > { %2931 = vmatprep.subr.bf16.mxu1 %v3191_v8  ;;  %861 = vmatprep.mubr.bf16.mxu0 %v728_v50  ;;  %v3238_v8 = vld [vmem:[%s3972_s1 + $0x250] sm:$0xff]  }
  0x3a   : > { %1064 = vmatprep.mubr.bf16.mxu1 %v931_v53  ;;  %v3259_v50 = vld [vmem:[%s3972_s1 + $0x3f0] sm:$0xff]  }
  0x3b   : > { %2904 = vmatpush3.bf16.msra.mxu0 %v3192_v11  ;;  %v3241_v11 = vld [vmem:[%s3972_s1 + $0x290] sm:$0xff]  }
  0x3c   : > { %2932 = vmatpush3.bf16.msra.mxu1 %v3193_v10  ;;  %2905 = vmatprep.subr.bf16.mxu0 %v3194_v13  ;;  %v3240_v10 = vld [vmem:[%s3972_s1 + $0x210] sm:$0xff]   ;;  %v1141_v13 = vshrl.u32 %v3618_v36, 16 }
  0x3d   : > { %2933 = vmatprep.subr.bf16.mxu1 %v3195_v12  ;;  %v3242_v12 = vld [vmem:[%s3972_s1 + $0x248] sm:$0xff]  }
  0x3f   : > { %2906 = vmatpush3.bf16.msra.mxu0 %v3196_v15  ;;  %v1144_v15 = vshll.u32 %v3618_v36, 16 }
  0x40   : > { %2934 = vmatpush3.bf16.msra.mxu1 %v3197_v14  ;;  %2907 = vmatprep.subr.bf16.mxu0 %v3198_v17  ;;  %v3243_v14 = vld [vmem:[%s3972_s1 + $0x2c8] sm:$0xff]   ;;  %v1124_v17 = vshrl.u32 %v3615_v35, 16 }
  0x41   : > { %2935 = vmatprep.subr.bf16.mxu1 %v3199_v16  ;;  %v3244_v16 = vld [vmem:[%s3972_s1 + $0x208] sm:$0xff]  }
  0x43   : > { %2908 = vmatpush3.bf16.msra.mxu0 %v3200_v19  ;;  %v1127_v19 = vshll.u32 %v3615_v35, 16  ;;  %v2652_v35 = vcombine.low %v3491_v33, %v3494_v34 }
  0x44   : > { %2936 = vmatpush3.bf16.msra.mxu1 %v3201_v18  ;;  %2909 = vmatprep.subr.bf16.mxu0 %v3204_v21  ;;  %v3245_v18 = vld [vmem:[%s3972_s1 + $0x288] sm:$0xff]   ;;  %v1143_v21 = vrot.slane %v1141_v13, 3  ;;  %v3285_v13 = vld [vmem:[%s3972_s1 + $0x3c0] sm:$0xff]  }
  0x45   : > { %2937 = vmatprep.subr.bf16.mxu1 %v3205_v20  ;;  %v3246_v20 = vld [vmem:[%s3972_s1 + $0x240] sm:$0xff]   ;;  %v1129_v27 = vrot.slane %v1127_v19, 4 }
  0x47   : > { %2910 = vmatpush3.bf16.msra.mxu0 %v3206_v23  ;;  %v1146_v23 = vrot.slane %v1144_v15, 4  ;;  %v3287_v15 = vld [vmem:[%s3972_s1 + $0x380] sm:$0xff]  }
  0x48   : > { %2938 = vmatpush3.bf16.msra.mxu1 %v3207_v22  ;;  %2911 = vmatprep.subr.bf16.mxu0 %v3208_v25  ;;  %v3247_v22 = vld [vmem:[%s3972_s1 + $0x2c0] sm:$0xff]   ;;  %v1126_v25 = vrot.slane %v1124_v17, 3 }
  0x49   : > { %2939 = vmatprep.subr.bf16.mxu1 %v3209_v24  ;;  %v3248_v24 = vld [vmem:[%s3972_s1 + $0x200] sm:$0xff]   ;;  %v1147_v43 = vor.u32 %v1146_v23, %v1143_v21 }
  0x4a   : > { %v1130_v44 = vor.u32 %v1129_v27, %v1126_v25  ;;  %v1499_v17 = vld [vmem:[%s3481_s12 + $0x20] sm:$0x33] }
  0x4b   : > { %2912 = vmatpush3.bf16.msra.mxu0 %v3210_v37  ;;  %v3286_v23 = vld [vmem:[%s3972_s1 + $0x300] sm:$0xff]  }
  0x4c   : > { %2940 = vmatpush3.bf16.msra.mxu1 %v3211_v26  ;;  %2953 = vmatprep.subr.bf16.mxu0 %v3218_v45  ;;  %v3249_v26 = vld [vmem:[%s3972_s1 + $0x280] sm:$0xff]  }
  0x4d   : > { %2981 = vmatprep.subr.bf16.mxu1 %v3219_v46 }
  0x4e   : > { %862 = vmatmul.mubr.bf16.vlgmr.msra.gmra.mxu0 %v725_v52 }
  0x4f   : > { %1065 = vmatmul.mubr.bf16.vlgmr.msra.gmra.mxu1 %v928_v54  ;;  %2954 = vmatpush3.bf16.msra.mxu0 %v3220_v49  ;;  %v3261_v54 = vld [vmem:[%s3972_s1 + $0x3b0] sm:$0xff]  }
  0x50   : > { %2982 = vmatpush3.bf16.msra.mxu1 %v3221_v51  ;;  %2955 = vmatprep.subr.bf16.mxu0 %v3222_v55  ;;  %v3258_v51 = vld [vmem:[%s3972_s1 + $0x370] sm:$0xff]  }
  0x51   : > { %2983 = vmatprep.subr.bf16.mxu1 %v3223_v56  ;;  %869 = vmatprep.mubr.bf16.mxu0 %v727_v28  ;;  %v3735_v28 = vld [vmem:[%s3481_s12 + $0x18] sm:$0xff]  ;;  %v3260_v55 = vld [vmem:[%s3972_s1 + $0x330] sm:$0xff]  }
  0x52   : > { %1072 = vmatprep.mubr.bf16.mxu1 %v930_v48  ;;  %v2603_v30 = vcombine.high %v3494_v34, %v3735_v28  ;;  %v2602_v31 = vcombine.low %v3494_v34, %v3735_v28  ;;  %v2655_v36 = vcombine.high %v3735_v28, %v3735_v28  ;;  %v2654_v56 = vcombine.low %v3735_v28, %v3735_v28 }
  0x53   : > { %2956 = vmatpush3.bf16.msra.mxu0 %v3224_v57  ;;  %v3263_v57 = vld [vmem:[%s3972_s1 + $0x3e8] sm:$0xff]   ;;  %v2707_v21 = vcombine.high %v3735_v28, %v1499_v17 }
  0x54   : > { %2984 = vmatpush3.bf16.msra.mxu1 %v3225_v58  ;;  %2957 = vmatprep.subr.bf16.mxu0 %v3226_v59  ;;  %v1149_v37 = vshrl.u32 %v2603_v30, 16  ;;  %v1132_v39 = vshrl.u32 %v2602_v31, 16  ;;  %v1135_v41 = vshll.u32 %v2602_v31, 16  ;;  %v3262_v58 = vld [vmem:[%s3972_s1 + $0x368] sm:$0xff]  }
  0x55   : > { %2985 = vmatprep.subr.bf16.mxu1 %v3227_v60  ;;  %v3266_v59 = vld [vmem:[%s3972_s1 + $0x3a8] sm:$0xff]  }
  0x56   : > { %870 = vmatmul.mubr.bf16.gmra.mxu0 %v724_v38  ;;  %v1152_v38 = vshll.u32 %v2603_v30, 16  ;;  %v1151_v45 = vrot.slane %v1149_v37, 3  ;;  %v1134_v47 = vrot.slane %v1132_v39, 3  ;;  %v1137_v33 = vrot.slane %v1135_v41, 4  ;;  %v3265_v60 = vld [vmem:[%s3972_s1 + $0x328] sm:$0xff]   ;;  %v3295_v41 = vld [vmem:[%s3972_s1 + $0x438] sm:$0xff]  }
  0x57   : > { %1073 = vmatmul.mubr.bf16.gmra.mxu1 %v927_v40  ;;  %2958 = vmatpush3.bf16.msra.mxu0 %v3228_v61  ;;  %v3256_v40 = vld [vmem:[%s3972_s1 + $0x338] sm:$0xff]   ;;  %v3269_v61 = vld [vmem:[%s3972_s1 + $0x3e0] sm:$0xff]  }
  0x58   : > { %2986 = vmatpush3.bf16.msra.mxu1 %v3229_v62  ;;  %2959 = vmatprep.subr.bf16.mxu0 %v3230_v63  ;;  %v1154_v46 = vrot.slane %v1152_v38, 4  ;;  %v1138_v49 = vor.u32 %v1137_v33, %v1134_v47  ;;  %v3268_v62 = vld [vmem:[%s3972_s1 + $0x360] sm:$0xff]  }
  0x59   : > { %2987 = vmatprep.subr.bf16.mxu1 %v3231_v0  ;;  %1477 = vmatprep.mubr.bf16.mxu1 %v2653_v1  ;;  %v3271_v63 = vld [vmem:[%s3972_s1 + $0x3a0] sm:$0xff]   ;;  %v3273_v1 = vld [vmem:[%s3972_s1 + $0x3d8] sm:$0xff]  }
  0x5a   : > { %v1155_v48 = vor.u32 %v1154_v46, %v1151_v45  ;;  %v1139_v53 = vsel %vm1122_vm3, %v1130_v44, %v1138_v49  ;;  %v3270_v0 = vld [vmem:[%s3972_s1 + $0x320] sm:$0xff]  }
  0x5b   : > { %2960 = vmatpush3.bf16.msra.mxu0 %v3232_v2  ;;  %v3272_v2 = vld [vmem:[%s3972_s1 + $0x358] sm:$0xff]  }
  0x5c   : > { %2988 = vmatpush3.bf16.msra.mxu1 %v3233_v3  ;;  %2961 = vmatprep.subr.bf16.mxu0 %v3234_v4  ;;  %v1156_v52 = vsel %vm1122_vm3, %v1147_v43, %v1155_v48  ;;  %v3275_v3 = vld [vmem:[%s3972_s1 + $0x398] sm:$0xff]  }
  0x5d   : > { %2989 = vmatprep.subr.bf16.mxu1 %v3235_v5  ;;  %1289 = vmatprep.mubr.bf16.mxu0 %v1156_v52  ;;  %v3274_v4 = vld [vmem:[%s3972_s1 + $0x318] sm:$0xff]   ;;  %v3277_v5 = vld [vmem:[%s3972_s1 + $0x3d0] sm:$0xff]  }
  0x5f   : > { %2962 = vmatpush3.bf16.msra.mxu0 %v3236_v6  ;;  %v3276_v6 = vld [vmem:[%s3972_s1 + $0x350] sm:$0xff]  }
  0x60   : > { %2990 = vmatpush3.bf16.msra.mxu1 %v3237_v7  ;;  %2963 = vmatprep.subr.bf16.mxu0 %v3238_v8  ;;  %v3279_v7 = vld [vmem:[%s3972_s1 + $0x390] sm:$0xff]  }
  0x61   : > { %2991 = vmatprep.subr.bf16.mxu1 %v3239_v9  ;;  %v3278_v8 = vld [vmem:[%s3972_s1 + $0x310] sm:$0xff]   ;;  %v3281_v9 = vld [vmem:[%s3972_s1 + $0x3c8] sm:$0xff]  }
  0x63   : > { %2964 = vmatpush3.bf16.msra.mxu0 %v3240_v10  ;;  %v3280_v10 = vld [vmem:[%s3972_s1 + $0x348] sm:$0xff]  }
  0x64   : > { %2992 = vmatpush3.bf16.msra.mxu1 %v3241_v11  ;;  %2965 = vmatprep.subr.bf16.mxu0 %v3242_v12  ;;  %v3283_v11 = vld [vmem:[%s3972_s1 + $0x388] sm:$0xff]  }
  0x65   : > { %2993 = vmatprep.subr.bf16.mxu1 %v3243_v14  ;;  %v3282_v12 = vld [vmem:[%s3972_s1 + $0x308] sm:$0xff]   ;;  %v3284_v14 = vld [vmem:[%s3972_s1 + $0x340] sm:$0xff]  }
  0x67   : > { %2966 = vmatpush3.bf16.msra.mxu0 %v3244_v16  ;;  %v1496_v16 = vld [vmem:[%s3481_s12 + $0x8] sm:$0xcc] }
  0x68   : > { %2994 = vmatpush3.bf16.msra.mxu1 %v3245_v18  ;;  %2967 = vmatprep.subr.bf16.mxu0 %v3246_v20  ;;  %v2704_v18 = vcombine.low %v1496_v16, %v3494_v34  ;;  %v2705_v19 = vcombine.high %v1496_v16, %v3494_v34  ;;  %v2706_v20 = vcombine.low %v3735_v28, %v1499_v17  ;;  %v3294_v34 = vld [vmem:[%s3972_s1 + $0x478] sm:$0xff]  }
  0x69   : > { %2995 = vmatprep.subr.bf16.mxu1 %v3247_v22  ;;  %v1707_v22 = vld [vmem:[%s3481_s12 + $0x20] sm:$0x77] }
  0x6a   : > { %v3856_v25 = vcombine.high %v3735_v28, %v1707_v22  ;;  %v1553_v27 = vrot.slane %v2705_v19, 2  ;;  %v1550_v30 = vrot.slane %v2704_v18, 2  ;;  %v1765_v31 = vshrl.u32 %v2705_v19, 16 }
  0x6b   : > { %2968 = vmatpush3.bf16.msra.mxu0 %v3248_v24  ;;  %v3853_v24 = vcombine.low %v3735_v28, %v1707_v22  ;;  %v1748_v38 = vshrl.u32 %v2704_v18, 16  ;;  %v1751_v39 = vshll.u32 %v2704_v18, 16 }
  0x6c   : > { %2996 = vmatpush3.bf16.msra.mxu1 %v3249_v26  ;;  %3009 = vmatprep.subr.bf16.mxu0 %v3253_v29  ;;  %v1551_v26 = vrot.slane %v2706_v20, 2  ;;  %v1554_v29 = vrot.slane %v2707_v21, 2 }
  0x6d   : > { %3037 = vmatprep.subr.bf16.mxu1 %v3254_v32  ;;  %v1768_v32 = vshll.u32 %v2705_v19, 16  ;;  %v1750_v46 = vrot.slane %v1748_v38, 2  ;;  %v1753_v47 = vrot.slane %v1751_v39, 3  ;;  %v1756_v33 = vshrl.u32 %v3853_v24, 16 }
  0x6e   : > { %1290 = vmatmul.mubr.bf16.vlgmr.msra.gmra.mxu0 %v1139_v53  ;;  %v1555_v28 = vsel %vm1549_vm4, %v1553_v27, %v1554_v29  ;;  %v1552_v37 = vsel %vm1549_vm4, %v1550_v30, %v1551_v26 }
  0x6f   : > { %1478 = vmatmul.mubr.bf16.vlgmr.msra.gmra.mxu1 %v2652_v35  ;;  %3010 = vmatpush3.bf16.msra.mxu0 %v3256_v40  ;;  %v1773_v35 = vshrl.u32 %v3856_v25, 16  ;;  %v1770_v43 = vrot.slane %v1768_v32, 3  ;;  %v1759_v40 = vshll.u32 %v3853_v24, 16  ;;  %v1758_v52 = vrot.slane %v1756_v33, 2 }
  0x70   : > { %3038 = vmatpush3.bf16.msra.mxu1 %v3257_v42  ;;  %1485 = vmatprep.mubr.bf16.mxu1 %v2655_v36  ;;  %v1776_v36 = vshll.u32 %v3856_v25, 16  ;;  %v1767_v42 = vrot.slane %v1765_v31, 2 }
  0x71   : > { %3039 = vmatprep.subr.bf16.mxu1 %v3259_v50  ;;  %1297 = vmatprep.mubr.bf16.mxu0 %v1155_v48  ;;  %v1775_v44 = vrot.slane %v1773_v35, 2  ;;  %v3296_v50 = vld [vmem:[%s3972_s1 + $0x470] sm:$0xff]   ;;  %v1761_v53 = vrot.slane %v1759_v40, 3 }
  0x72   : > { %3011 = vmatprep.subr.bf16.mxu0 %v3258_v51  ;;  %v1778_v45 = vrot.slane %v1776_v36, 3  ;;  %v1771_v48 = vor.u32 %v1770_v43, %v1767_v42  ;;  %v1754_v51 = vor.u32 %v1753_v47, %v1750_v46 }
  0x73   : > { %3012 = vmatpush3.bf16.msra.mxu0 %v3260_v55  ;;  %v1762_v55 = vor.u32 %v1761_v53, %v1758_v52 }
  0x74   : > { %3040 = vmatpush3.bf16.msra.mxu1 %v3261_v54  ;;  %3013 = vmatprep.subr.bf16.mxu0 %v3262_v58 }
  0x75   : > { %3041 = vmatprep.subr.bf16.mxu1 %v3263_v57  ;;  %v3298_v57 = vld [vmem:[%s3972_s1 + $0x468] sm:$0xff]   ;;  %v1763_v58 = vsel %vm1746_vm5, %v1754_v51, %v1762_v55 }
  0x76   : > { %1298 = vmatmul.mubr.bf16.gmra.mxu0 %v1138_v49  ;;  %v1779_v49 = vor.u32 %v1778_v45, %v1775_v44 }
  0x77   : > { %1486 = vmatmul.mubr.bf16.gmra.mxu1 %v2654_v56  ;;  %3014 = vmatpush3.bf16.msra.mxu0 %v3265_v60  ;;  %v3297_v56 = vld [vmem:[%s3972_s1 + $0x430] sm:$0xff]   ;;  %v3300_v60 = vld [vmem:[%s3972_s1 + $0x460] sm:$0xff]  }
  0x78   : > { %3042 = vmatpush3.bf16.msra.mxu1 %v3266_v59  ;;  %3015 = vmatprep.subr.bf16.mxu0 %v3268_v62  ;;  %v1780_v54 = vsel %vm1746_vm5, %v1771_v48, %v1779_v49  ;;  %v3299_v59 = vld [vmem:[%s3972_s1 + $0x428] sm:$0xff]   ;;  %v3302_v62 = vld [vmem:[%s3972_s1 + $0x458] sm:$0xff]  }
  0x79   : > { %3043 = vmatprep.subr.bf16.mxu1 %v3269_v61  ;;  %1688 = vmatprep.mubr.bf16.mxu0 %v1555_v28  ;;  %v3301_v61 = vld [vmem:[%s3972_s1 + $0x420] sm:$0xff]  }
  0x7a   : > { %1913 = vmatprep.mubr.bf16.mxu1 %v1780_v54 }
  0x7b   : > { %3016 = vmatpush3.bf16.msra.mxu0 %v3270_v0  ;;  %v3312_v0 = vld [vmem:[%s3481_s12 + $0x10] sm:$0xff] }
  0x7c   : > { %3044 = vmatpush3.bf16.msra.mxu1 %v3271_v63  ;;  %3017 = vmatprep.subr.bf16.mxu0 %v3272_v2  ;;  %v1932_v63 = vld [vmem:[%s3481_s12 + $0x8] sm:$0x88]  ;;  %v1975_v2 = vrot.slane %v3856_v25, 3 }
  0x7d   : > { %3045 = vmatprep.subr.bf16.mxu1 %v3273_v1  ;;  %v2807_v1 = vcombine.high %v1932_v63, %v3312_v0 }
  0x7f   : > { %3018 = vmatpush3.bf16.msra.mxu0 %v3274_v4  ;;  %v1974_v4 = vrot.slane %v2807_v1, 3 }
  0x80   : > { %3046 = vmatpush3.bf16.msra.mxu1 %v3275_v3  ;;  %3019 = vmatprep.subr.bf16.mxu0 %v3276_v6  ;;  %v3303_v3 = vld [vmem:[%s3972_s1 + $0x418] sm:$0xff]  }
  0x81   : > { %3047 = vmatprep.subr.bf16.mxu1 %v3277_v5  ;;  %v3304_v5 = vld [vmem:[%s3972_s1 + $0x450] sm:$0xff]   ;;  %v1976_v6 = vsel %vm925_vm2, %v1974_v4, %v1975_v2 }
  0x83   : > { %3020 = vmatpush3.bf16.msra.mxu0 %v3278_v8  ;;  %v3306_v8 = vld [vmem:[%s3972_s1 + $0x448] sm:$0xff]  }
  0x84   : > { %3048 = vmatpush3.bf16.msra.mxu1 %v3279_v7  ;;  %3021 = vmatprep.subr.bf16.mxu0 %v3280_v10  ;;  %v3305_v7 = vld [vmem:[%s3972_s1 + $0x410] sm:$0xff]   ;;  %v2806_v10 = vcombine.low %v1932_v63, %v3312_v0 }
  0x85   : > { %3049 = vmatprep.subr.bf16.mxu1 %v3281_v9  ;;  %v3307_v9 = vld [vmem:[%s3972_s1 + $0x408] sm:$0xff]  }
  0x87   : > { %3022 = vmatpush3.bf16.msra.mxu0 %v3282_v12  ;;  %v3309_v12 = vld [vmem:[%s3972_s1 + $0x400] sm:$0xff]  }
  0x88   : > { %3050 = vmatpush3.bf16.msra.mxu1 %v3283_v11  ;;  %3023 = vmatprep.subr.bf16.mxu0 %v3284_v14  ;;  %v3308_v11 = vld [vmem:[%s3972_s1 + $0x440] sm:$0xff]   ;;  %v1972_v14 = vrot.slane %v3853_v24, 3 }
  0x89   : > { %3051 = vmatprep.subr.bf16.mxu1 %v3285_v13  ;;  %v1971_v13 = vrot.slane %v2806_v10, 3 }
  0x8b   : > { %3024 = vmatpush3.bf16.msra.mxu0 %v3286_v23 }
  0x8c   : > { %3052 = vmatpush3.bf16.msra.mxu1 %v3287_v15  ;;  %3065 = vmatprep.subr.bf16.mxu0 %v3294_v34  ;;  %v1973_v15 = vsel %vm925_vm2, %v1971_v13, %v1972_v14 }
  0x8d   : > { %3093 = vmatprep.subr.bf16.mxu1 %v3294_v34 }
  0x8e   : > { %1689 = vmatmul.mubr.bf16.vlgmr.msra.gmra.mxu0 %v1552_v37 }
  0x8f   : > { %3066 = vmatpush3.bf16.msra.mxu0 %v3295_v41  ;;  %1696 = vmatprep.mubr.bf16.mxu0 %v1554_v29 }
  0x90   : > { %3067 = vmatprep.subr.bf16.mxu0 %v3296_v50  ;;  %1914 = vmatmul.mubr.bf16.vlgmr.msra.gmra.mxu1 %v1763_v58 }
  0x91   : > { %3101 = vmatpush3.bf16.msra.mxu1 %v3295_v41  ;;  %1921 = vmatprep.mubr.bf16.mxu1 %v1779_v49 }
  0x92   : > { %3094 = vmatprep.subr.bf16.mxu1 %v3296_v50 }
  0x93   : > { %3068 = vmatpush3.bf16.msra.mxu0 %v3297_v56 }
  0x94   : > { %3069 = vmatprep.subr.bf16.mxu0 %v3298_v57 }
  0x95   : > { %3102 = vmatpush3.bf16.msra.mxu1 %v3297_v56 }
  0x96   : > { %1697 = vmatmul.mubr.bf16.gmra.mxu0 %v1551_v26  ;;  %3095 = vmatprep.subr.bf16.mxu1 %v3298_v57 }
  0x97   : > { %3070 = vmatpush3.bf16.msra.mxu0 %v3299_v59  ;;  %2109 = vmatprep.mubr.bf16.mxu0 %v1976_v6 }
  0x98   : > { %3071 = vmatprep.subr.bf16.mxu0 %v3300_v60  ;;  %1922 = vmatmul.mubr.bf16.gmra.mxu1 %v1762_v55 }
  0x99   : > { %3103 = vmatpush3.bf16.msra.mxu1 %v3299_v59  ;;  %2117 = vmatprep.mubr.bf16.mxu1 %v1975_v2 }
  0x9a   : > { %3096 = vmatprep.subr.bf16.mxu1 %v3300_v60 }
  0x9b   : > { %3072 = vmatpush3.bf16.msra.mxu0 %v3301_v61 }
  0x9c   : > { %3073 = vmatprep.subr.bf16.mxu0 %v3302_v62 }
  0x9d   : > { %3104 = vmatpush3.bf16.msra.mxu1 %v3301_v61 }
  0x9e   : > { %3097 = vmatprep.subr.bf16.mxu1 %v3302_v62 }
  0x9f   : > { %3074 = vmatpush3.bf16.msra.mxu0 %v3303_v3 }
  0xa0   : > { %3075 = vmatprep.subr.bf16.mxu0 %v3304_v5 }
  0xa1   : > { %3105 = vmatpush3.bf16.msra.mxu1 %v3303_v3 }
  0xa2   : > { %3098 = vmatprep.subr.bf16.mxu1 %v3304_v5 }
  0xa3   : > { %3076 = vmatpush3.bf16.msra.mxu0 %v3305_v7 }
  0xa4   : > { %3077 = vmatprep.subr.bf16.mxu0 %v3306_v8 }
  0xa5   : > { %3106 = vmatpush3.bf16.msra.mxu1 %v3305_v7 }
  0xa6   : > { %3099 = vmatprep.subr.bf16.mxu1 %v3306_v8 }
  0xa7   : > { %3078 = vmatpush3.bf16.msra.mxu0 %v3307_v9 }
  0xa8   : > { %3079 = vmatprep.subr.bf16.mxu0 %v3308_v11 }
  0xa9   : > { %3107 = vmatpush3.bf16.msra.mxu1 %v3307_v9 }
  0xaa   : > { %3100 = vmatprep.subr.bf16.mxu1 %v3308_v11 }
  0xab   : > { %3080 = vmatpush3.bf16.msra.mxu0 %v3309_v12 }
  0xad   : > { %3108 = vmatpush3.bf16.msra.mxu1 %v3309_v12 }
  0xae   : > { %2110 = vmatmul.mubr.bf16.vlgmr.msra.gmra.mxu0 %v1973_v15 }
  0xb0   : > { %2118 = vmatmul.mubr.bf16.vlgmr.msra.gmra.mxu1 %v1972_v14 }
  0xee   : > { %v2857_v21 = vpop.f32.mrf.mxu0 }
  0xef   : > { %v2885_v16 = vpop.f32.mrf.mxu1 }
  0xf0   : > { %v2858_v23 = vpop.f32.mrf.mxu0 }
  0xf1   : > { %v2886_v17 = vpop.f32.mrf.mxu1  ;;  %v2859_v25 = vadd.f32 %v2858_v23, %v2857_v21 }
  0xf2   : > { %v2887_v18 = vadd.f32 %v2886_v17, %v2885_v16  ;;  %v2860_v34 = vpop.f32.mrf.mxu0 }
  0xf3   : > { %v2888_v19 = vpop.f32.mrf.mxu1 }
  0xf4   : > { %v670_v26 = vadd.f32 %v2887_v18, %v2859_v25  ;;  %v2861_v29 = vpop.f32.mrf.mxu0 }
  0xf5   : > { %v2889_v20 = vpop.f32.mrf.mxu1  ;;  %v2862_v31 = vadd.f32 %v2861_v29, %v2860_v34 }
  0xf6   : > { %v2890_v22 = vadd.f32 %v2889_v20, %v2888_v19  ;;  %v2863_v35 = vpop.f32.mrf.mxu0 }
  0xf7   : > { %v2891_v24 = vpop.f32.mrf.mxu1 }
  0xf8   : > { %v673_v36 = vadd.f32 %v2890_v22, %v2862_v31  ;;  %v2864_v37 = vpop.f32.mrf.mxu0 }
  0xf9   : > { %v2892_v27 = vpop.f32.mrf.mxu1  ;;  %v2865_v38 = vadd.f32 %v2864_v37, %v2863_v35 }
  0xfa   : > { %v2893_v30 = vadd.f32 %v2892_v27, %v2891_v24  ;;  %v2866_v39 = vpop.f32.mrf.mxu0 }
  0xfb   : > { %v2894_v32 = vpop.f32.mrf.mxu1 }
  0xfc   : > { %v678_v41 = vadd.f32 %v2893_v30, %v2865_v38  ;;  %v2867_v42 = vpop.f32.mrf.mxu0  ;;  %v2154_v30 = vlaneseq }
  0xfd   : > { %v2895_v28 = vpop.f32.mrf.mxu1 }
 0x10e   : > { %v2913_v44 = vpop.f32.mrf.mxu0 }
 0x10f   : > { %v2941_v43 = vpop.f32.mrf.mxu1 }
 0x110   : > { %v2914_v46 = vpop.f32.mrf.mxu0 }
 0x111   : > { %v2942_v45 = vpop.f32.mrf.mxu1  ;;  %v2915_v33 = vadd.f32 %v2914_v46, %v2913_v44 }
 0x112   : > { %v2943_v47 = vadd.f32 %v2942_v45, %v2941_v43  ;;  %v2916_v48 = vpop.f32.mrf.mxu0 }
 0x113   : > { %v2944_v40 = vpop.f32.mrf.mxu1  ;;  %v877_v49 = vadd.f32 %v2915_v33, %v670_v26 }
 0x114   : > { %v2917_v51 = vpop.f32.mrf.mxu0 }
 0x115   : > { %v2945_v50 = vpop.f32.mrf.mxu1  ;;  %v1080_v53 = vadd.f32 %v2943_v47, %v877_v49  ;;  %v2918_v54 = vadd.f32 %v2917_v51, %v2916_v48 }
 0x116   : > { %v2946_v52 = vadd.f32 %v2945_v50, %v2944_v40  ;;  %v2919_v56 = vpop.f32.mrf.mxu0 }
 0x117   : > { %v2947_v55 = vpop.f32.mrf.mxu1  ;;  %v878_v57 = vadd.f32 %v2918_v54, %v673_v36  ;;  %v2155_v36 = vshrl.u32 %v2154_v30, 7 }
 0x118   : > { %v2920_v59 = vpop.f32.mrf.mxu0 }
 0x119   : > { %v2948_v58 = vpop.f32.mrf.mxu1  ;;  %v1081_v61 = vadd.f32 %v2946_v52, %v878_v57  ;;  %v2921_v62 = vadd.f32 %v2920_v59, %v2919_v56  ;;  %v2156_v38 = vadd.s32 8, %v2155_v36  ;;  %v2157_v42 = vadd.s32 16, %v2155_v36 }
 0x11a   : > { %v2949_v60 = vadd.f32 %v2948_v58, %v2947_v55  ;;  %v2922_v0 = vpop.f32.mrf.mxu0  ;;  %v3920_v43 = vmul.u32.u64.low 2863311531, %v2155_v36  ;;  %v3921_v44 = vmul.u32.u64.high 2863311531, %v2155_v36, %v3920_v43 }
 0x11b   : > { %v2950_v63 = vpop.f32.mrf.mxu1  ;;  %v879_v1 = vadd.f32 %v2921_v62, %v678_v41  ;;  %v3923_v47 = vmul.u32.u64.low 2863311531, %v2156_v38  ;;  %v3924_v33 = vmul.u32.u64.high 2863311531, %v2156_v38, %v3923_v47  ;;  %v3337_v43 = vmov 0.0  }
 0x11c   : > { %v2923_v3 = vpop.f32.mrf.mxu0  ;;  %v3926_v49 = vmul.u32.u64.low 2863311531, %v2157_v42  ;;  %v3927_v50 = vmul.u32.u64.high 2863311531, %v2157_v42, %v3926_v49  ;;  %v2164_v54 = vshrl.u32 %v3921_v44, 2 }
 0x11d   : > { %v2951_v2 = vpop.f32.mrf.mxu1  ;;  %v1082_v4 = vadd.f32 %v2949_v60, %v879_v1  ;;  %v2175_v56 = vshrl.u32 %v3924_v33, 2 }
 0x11e   : > { %v2186_v57 = vshrl.u32 %v3927_v50, 2  ;;  %v2165_v58 = vmul.u32 6, %v2164_v54 }
 0x11f   : > { %v2176_v59 = vmul.u32 6, %v2175_v56 }
 0x120   : > { %v2187_v60 = vmul.u32 6, %v2186_v57  ;;  %v2166_v62 = vsub.s32 %v2155_v36, %v2165_v58 }
 0x121   : > { %v2177_v0 = vsub.s32 %v2156_v38, %v2176_v59 }
 0x122   : > { %v2188_v1 = vsub.s32 %v2157_v42, %v2187_v60  ;;  %vm2191_vm6 = vcmp.ne.s32.totalorder %v2166_v62, 0  ;;  %vm2194_vm7 = vcmp.lt.s32.totalorder %v2166_v62, 0 }
 0x123   : > { %vm2192_vm8 = vcmp.ne.s32.totalorder %v2177_v0, 0  ;;  %vm2195_vm9 = vcmp.lt.s32.totalorder %v2177_v0, 0  ;;  %vm3932_vm12 = vmand %vm2194_vm7, %vm2191_vm6 }
 0x124   : > { %vm2193_vm10 = vcmp.ne.s32.totalorder %v2188_v1, 0  ;;  %vm2196_vm11 = vcmp.lt.s32.totalorder %v2188_v1, 0  ;;  %vm3936_vm13 = vmand %vm2195_vm9, %vm2192_vm8 }
 0x125   : > { %vm3941_vm14 = vmand %vm2196_vm11, %vm2193_vm10 }
 0x12e   : > { %v2969_v9 = vpop.f32.mrf.mxu0 }
 0x12f   : > { %v2997_v5 = vpop.f32.mrf.mxu1 }
 0x130   : > { %v2970_v11 = vpop.f32.mrf.mxu0 }
 0x131   : > { %v2998_v6 = vpop.f32.mrf.mxu1  ;;  %v2971_v12 = vadd.f32 %v2970_v11, %v2969_v9 }
 0x132   : > { %v2999_v7 = vadd.f32 %v2998_v6, %v2997_v5  ;;  %v2972_v14 = vpop.f32.mrf.mxu0 }
 0x133   : > { %v3000_v8 = vpop.f32.mrf.mxu1  ;;  %v1305_v15 = vadd.f32 %v2971_v12, %v1080_v53  ;;  %v2200_v12 = vadd.s32 6, %v2166_v62 }
 0x134   : > { %v2973_v17 = vpop.f32.mrf.mxu0 }
 0x135   : > { %v3001_v10 = vpop.f32.mrf.mxu1  ;;  %v1493_v18 = vadd.f32 %v2999_v7, %v1305_v15  ;;  %v2974_v19 = vadd.f32 %v2973_v17, %v2972_v14  ;;  %v2201_v14 = vadd.s32 6, %v2177_v0 }
 0x136   : > { %v3002_v20 = vadd.f32 %v3001_v10, %v3000_v8  ;;  %v2975_v22 = vpop.f32.mrf.mxu0 }
 0x137   : > { %v3003_v13 = vpop.f32.mrf.mxu1  ;;  %v1306_v23 = vadd.f32 %v2974_v19, %v1081_v61 }
 0x138   : > { %v2976_v24 = vpop.f32.mrf.mxu0 }
 0x139   : > { %v3004_v16 = vpop.f32.mrf.mxu1  ;;  %v1494_v34 = vadd.f32 %v3002_v20, %v1306_v23  ;;  %v2977_v61 = vadd.f32 %v2976_v24, %v2975_v22 }
 0x13a   : > { %v2978_v26 = vpop.f32.mrf.mxu0  ;;  %v3005_v3 = vadd.f32 %v3004_v16, %v3003_v13  ;;  %v2202_v16 = vadd.s32 6, %v2188_v1 }
 0x13b   : > { %v3006_v21 = vpop.f32.mrf.mxu1  ;;  %v1307_v2 = vadd.f32 %v2977_v61, %v1082_v4  ;;  %v2203_v26 = vsel %vm3932_vm12, %v2200_v12, %v2166_v62 }
 0x13c   : > { %v2979_v27 = vpop.f32.mrf.mxu0  ;;  %v2205_v30 = vsel %vm3941_vm14, %v2202_v16, %v2188_v1  ;;  %vm2206_vm15 = vcmp.lt.s32.totalorder %v2203_v26, 4 }
 0x13d   : > { %v3007_v25 = vpop.f32.mrf.mxu1  ;;  %v1495_v10 = vadd.f32 %v3005_v3, %v1307_v2  ;;  %v2204_v27 = vsel %vm3936_vm13, %v2201_v14, %v2177_v0  ;;  %vm2208_vm1 = vcmp.lt.s32.totalorder %v2205_v30, 4  ;;  %v2828_v44 = vsel %vm2206_vm15, 1.0, %v3337_v43 }
 0x13e   : > { %vm2207_vm0 = vcmp.lt.s32.totalorder %v2204_v27, 4 }
 0x13f   : > { %v2829_v47 = vsel %vm2207_vm0, 1.0, %v3337_v43 }
 0x14e   : > { %v3025_v29 = vpop.f32.mrf.mxu0 }
 0x150   : > { %v3026_v31 = vpop.f32.mrf.mxu0  ;;  %v3053_v32 = vpop.f32.mrf.mxu1 }
 0x151   : > { %v3027_v63 = vadd.f32 %v3026_v31, %v3025_v29 }
 0x152   : > { %v3028_v35 = vpop.f32.mrf.mxu0  ;;  %v3054_v28 = vpop.f32.mrf.mxu1 }
 0x153   : > { %v1704_v5 = vadd.f32 %v3027_v63, %v1493_v18  ;;  %v3055_v6 = vadd.f32 %v3054_v28, %v3053_v32 }
 0x154   : > { %v3029_v37 = vpop.f32.mrf.mxu0  ;;  %v3056_v39 = vpop.f32.mrf.mxu1 }
 0x155   : > { %v3030_v7 = vadd.f32 %v3029_v37, %v3028_v35  ;;  %v1929_v4 = vadd.f32 %v3055_v6, %v1704_v5 }
 0x156   : > { %v3031_v41 = vpop.f32.mrf.mxu0  ;;  %v3057_v45 = vpop.f32.mrf.mxu1 }
 0x157   : > { %v1705_v13 = vadd.f32 %v3030_v7, %v1494_v34  ;;  %v3058_v18 = vadd.f32 %v3057_v45, %v3056_v39  ;;  %v2824_v34 = vld [vmem:[%s3973_s2] ss:$0 sm:$0xff] }
 0x158   : > { %v3032_v46 = vpop.f32.mrf.mxu0  ;;  %v3059_v40 = vpop.f32.mrf.mxu1 }
 0x159   : > { %v3033_v8 = vadd.f32 %v3032_v46, %v3031_v41  ;;  %v1930_v32 = vadd.f32 %v3058_v18, %v1705_v13 }
 0x15a   : > { %v3034_v48 = vpop.f32.mrf.mxu0  ;;  %v3060_v51 = vpop.f32.mrf.mxu1 }
 0x15b   : > { %v1706_v19 = vadd.f32 %v3033_v8, %v1495_v10  ;;  %v3061_v20 = vadd.f32 %v3060_v51, %v3059_v40  ;;  %v2830_v48 = vsel %vm2208_vm1, 1.0, %v3337_v43 }
 0x15c   : > { %v3035_v52 = vpop.f32.mrf.mxu0  ;;  %v3062_v53 = vpop.f32.mrf.mxu1 }
 0x15d   : > { %v1931_v35 = vadd.f32 %v3061_v20, %v1706_v19 }
 0x15e   : > { %v3063_v55 = vpop.f32.mrf.mxu1 }
 0x16e   : > { %v3081_v9 = vpop.f32.mrf.mxu0 }
 0x170   : > { %v3082_v15 = vpop.f32.mrf.mxu0  ;;  %v3087_v23 = vpop.f32.mrf.mxu1 }
 0x171   : > { %v3083_v21 = vadd.f32 %v3082_v15, %v3081_v9 }
 0x172   : > { %v3084_v25 = vpop.f32.mrf.mxu0  ;;  %v3088_v29 = vpop.f32.mrf.mxu1 }
 0x173   : > { %v2125_v24 = vadd.f32 %v3083_v21, %v1929_v4  ;;  %v3089_v36 = vadd.f32 %v3088_v29, %v3087_v23 }
 0x174   : > { %v3085_v31 = vpop.f32.mrf.mxu0  ;;  %v3090_v38 = vpop.f32.mrf.mxu1 }
 0x175   : > { %v3086_v28 = vadd.f32 %v3085_v31, %v3084_v25  ;;  %v2135_v37 = vadd.f32 %v2824_v34, %v2125_v24  ;;  %v2127_v39 = vadd.f32 %v3089_v36, %v1931_v35 }
 0x176   : > { %v3091_v42 = vpop.f32.mrf.mxu1 }
 0x177   : > { %v2126_v41 = vadd.f32 %v3086_v28, %v1930_v32  ;;  %v2137_v45 = vadd.f32 %v2824_v34, %v2127_v39  ;;  %v2227_v33 = vmul.f32 %v2135_v37, %v2135_v37  ;;  %v2215_v50 = vmul.f32 %v2828_v44, %v2135_v37 }
 0x179   : > { %v2136_v46 = vadd.f32 %v2824_v34, %v2126_v41  ;;  %v2835_v40 = vpack.c.bf16 %v2137_v45, %v2137_v45  ;;  %v2229_v51 = vmul.f32 %v2137_v45, %v2137_v45  ;;  %v2230_v54 = vmul.f32 %v2828_v44, %v2227_v33 }
 0x17a   : > { %v2217_v55 = vmul.f32 %v2830_v48, %v2137_v45 }
 0x17b   : > { %v2839_v49 = vpack.c.bf16 %v2136_v46, %v2135_v37  ;;  %v2216_v52 = vmul.f32 %v2829_v47, %v2136_v46  ;;  %v2228_v53 = vmul.f32 %v2136_v46, %v2136_v46  ;;  %2153 = vst [vmem:[%s260_s14 + $0x8] sm:$0xf] %v2835_v40  ;;  %v2232_v58 = vmul.f32 %v2830_v48, %v2229_v51 }
 0x17d   : > { %2840 = vst [vmem:[%s260_s14] sm:$0xff] %v2839_v49   ;;  %v2218_v56 = vadd.f32 %v2216_v52, %v2215_v50  ;;  %v2231_v57 = vmul.f32 %v2829_v47, %v2228_v53 }
 0x17f   : > { %v2219_v59 = vadd.f32 %v2218_v56, %v2217_v55  ;;  %v2233_v60 = vadd.f32 %v2231_v57, %v2230_v54 }
 0x181   : > { %v2220_v61 = vrot.slane %v2219_v59, 4  ;;  %v2234_v62 = vadd.f32 %v2233_v60, %v2232_v58 }
 0x183   : > { %v2221_v63 = vadd.f32 %v2220_v61, %v2219_v59  ;;  %v2235_v0 = vrot.slane %v2234_v62, 4 }
 0x185   : > { %v2222_v1 = vrot.slane %v2221_v63, 2  ;;  %v2236_v2 = vadd.f32 %v2235_v0, %v2234_v62 }
 0x187   : > { %v2223_v3 = vadd.f32 %v2222_v1, %v2221_v63  ;;  %v2237_v5 = vrot.slane %v2236_v2, 2 }
 0x189   : > { %v2224_v6 = vrot.slane %v2223_v3, 1  ;;  %v2238_v7 = vadd.f32 %v2237_v5, %v2236_v2 }
 0x18b   : > { %v2225_v8 = vadd.f32 %v2224_v6, %v2223_v3  ;;  %v2239_v9 = vrot.slane %v2238_v7, 1 }
 0x18d   : > { %2226 = vst [vmem:[%s267_s22] sm:$0x1] %v2225_v8  ;;  %v2240_v10 = vadd.f32 %v2239_v9, %v2238_v7 }
 0x18f   : > { %2241 = vst [vmem:[%s267_s22 + $0x1] sm:$0x1] %v2240_v10 }
 0x190 PF: > { %s15_s17 = sadd.s32 1, %s3335_s17   ;;  %s3982_s15 = smov %s3331_s16 }
 0x191   : > { %p12_p5 = scmp.ge.s32.totalorder %s15_s17, 4   ;;  %s3983_s16 = smov %s3985_s18 }
 0x193   :  { %14 = sbr.rel (!%p12_p5) target bundleno = 2 (0x2), region = 88 }

// kernel: sgan_discriminator_forward.7
= control target key start
LH: loop header
LB: loop body
LE: loop exit
PB: predicated region body
PF: predicated region fallthrough
CT: control target
= control target key end

     0   :  { %s1072_s14 = smov 0   ;;  %s1074_s15 = smov 0   ;;  %s1380_s0 = inlined_call_operand.vmem [shape: bf16[2,18,512], index: 0, kind: input, shape index: {}]   ;;  %s1381_s1 = inlined_call_operand.vmem [shape: bf16[9,1,512], index: 1, kind: input, shape index: {}]   ;;  %s1382_s2 = inlined_call_operand.<no memory space> [shape: f32[1,1], index: 2, kind: input, shape index: {}]   ;;  %s1383_s3 = inlined_call_operand.vmem [shape: f32[2,8,1], index: 3, kind: output, shape index: {}]  }
   0x1   :  { %v8_v0 = vstv %s1382_s2  ;;  %s1076_s16 = smov 0  }
   0x2   :  { %9 = vst [vmem:[#allocation2] sm:$0x1] %v8_v0 }
   0x3 LB: > { %s24_s2 = sadd.s32 1, %s1043_s15  ;;  %p986_p0 = scmp.ge.s32.totalorder %s1047_s16, 1  ;;  %s1047_s16 = sphi %s1076_s16, %s15_s16   ;;  %s1043_s15 = sphi %s1074_s15, %s1385_s15   ;;  %s1039_s14 = sphi %s1072_s14, %s1384_s14  }
   0x4   : > { %p25_p1 = scmp.ge.s32.totalorder %s24_s2, 2  ;;  %p161_p2 = scmp.lt.s32.totalorder %s1047_s16, 3 }
   0x6   : > { %s1387_s2 = smov (%p25_p1, %s24_s2), 0  ;;  %p162_p3 = pnand %p986_p0, %p161_p2 }
   0x7   : > { %p190_p4 = scmp.lt.s32.totalorder (!%p162_p3), %s1039_s14, 1 }
   0x8   : > { %165 = sbr.rel (%p162_p3) target bundleno = 240 (0xf0), region = 32 }
   0xd   : > { %v207_v1 = vld [vmem:[%s1381_s1] sm:$0xff]   ;;  %v214_v2 = vlaneseq  ;;  %v990_v3 = vld [vmem:[%s1381_s1 + $0x8] sm:$0xff]   ;;  %s1389_s14 = smov (!%p190_p4, %s1039_s14), 1  ;;  %v992_v6 = vld [vmem:[%s1381_s1 + $0x10] sm:$0xff]   ;;  %vm396_vm0 = vcmask 1047554   ;;  %vm314_vm1 = vcmask 1047553  }
   0xe   : > { %v208_v4 = vunpack.c.l.bf16 %v207_v1  ;;  %v1104_v7 = vld [vmem:[%s1381_s1 + $0x1c] sm:$0xff]   ;;  %v994_v8 = vld [vmem:[%s1381_s1 + $0x18] sm:$0xf]  ;;  %v346_v9 = vunpack.c.l.bf16 %v990_v3  ;;  %v1109_v10 = vunpack.c.h.bf16 %v207_v1  ;;  %v1111_v11 = vunpack.c.h.bf16 %v990_v3  ;;  %s1000_s27 = smul.u32 48, %s1389_s14  ;;  %s988_s4 = sshll.u32 %s1389_s14, 3 }
   0xf   : > { %v215_v5 = vshrl.u32 %v214_v2, 7  ;;  %v1122_v16 = vunpack.c.l.bf16 %v992_v6  ;;  %v1124_v17 = vunpack.c.h.bf16 %v992_v6  ;;  %v1127_v18 = vunpack.c.l.bf16 %v1104_v7  ;;  %s204_s7 = scalar_lea.vmem %s1383_s3, %s988_s4 }
  0x10   : > { %v1129_v19 = vunpack.c.l.bf16 %v994_v8  ;;  %s1134_s30 = scalar_lea.vmem %s1380_s0, %s1000_s27  ;;  %vm406_vm2 = vcmask 1041408   ;;  %vm324_vm3 = vcmask 1040384   ;;  %vm484_vm4 = vcmask 1047556  }
  0x11   : > { %v1114_v12 = vsub.s32 0, %v215_v5  ;;  %v1116_v13 = vsub.s32 2, %v215_v5  ;;  %v1118_v14 = vsub.s32 4, %v215_v5  ;;  %v1120_v15 = vsub.s32 6, %v215_v5  ;;  %v205_v24 = vld [vmem:[%s1134_s30] sm:$0xff]  ;;  %v206_v25 = vld [vmem:[%s1134_s30 + $0x8] sm:$0xff] }
  0x12   : > { %v342_v26 = vld [vmem:[%s1134_s30] sm:$0xee]  ;;  %v209_v31 = vunpack.c.l.bf16 %v205_v24  ;;  %v210_v32 = vunpack.c.h.bf16 %v205_v24  ;;  %v211_v33 = vunpack.c.l.bf16 %v206_v25  ;;  %v212_v34 = vunpack.c.h.bf16 %v206_v25  ;;  %v343_v35 = vld [vmem:[%s1134_s30 + $0x8] sm:$0xee]  ;;  %v260_v0 = vld [vmem:[%s1134_s30 + $0x10] sm:$0x11] }
  0x13   : > { %v217_v20 = vrot.slane %v208_v4, %v1114_v12  ;;  %v221_v21 = vrot.slane %v208_v4, %v1116_v13  ;;  %v225_v22 = vrot.slane %v208_v4, %v1118_v14  ;;  %v229_v23 = vrot.slane %v208_v4, %v1120_v15  ;;  %v261_v5 = vld [vmem:[%s1134_s30 + $0x18] sm:$0x11] }
  0x14   : > { %v355_v27 = vrot.slane %v346_v9, %v1114_v12  ;;  %v359_v28 = vrot.slane %v346_v9, %v1116_v13  ;;  %v363_v29 = vrot.slane %v346_v9, %v1118_v14  ;;  %v367_v30 = vrot.slane %v346_v9, %v1120_v15 }
  0x15   : > { %v237_v36 = vrot.slane %v217_v20, %v1114_v12  ;;  %v241_v37 = vrot.slane %v221_v21, %v1114_v12  ;;  %v245_v38 = vrot.slane %v225_v22, %v1114_v12  ;;  %v249_v39 = vrot.slane %v229_v23, %v1114_v12 }
  0x16   : > { %v347_v40 = vunpack.c.l.bf16 %v342_v26  ;;  %v348_v41 = vunpack.c.h.bf16 %v342_v26  ;;  %v349_v42 = vunpack.c.l.bf16 %v343_v35  ;;  %v350_v43 = vunpack.c.h.bf16 %v343_v35 }
  0x17   : > { %v250_v44 = vmul.f32 %v237_v36, %v209_v31  ;;  %v251_v45 = vmul.f32 %v241_v37, %v210_v32  ;;  %v252_v46 = vmul.f32 %v245_v38, %v211_v33  ;;  %v253_v47 = vmul.f32 %v249_v39, %v212_v34 }
  0x18   : > { %v375_v48 = vrot.slane %v355_v27, %v1114_v12  ;;  %v379_v49 = vrot.slane %v359_v28, %v1114_v12  ;;  %v383_v50 = vrot.slane %v363_v29, %v1114_v12  ;;  %v387_v51 = vrot.slane %v367_v30, %v1114_v12 }
  0x19   : > { %v254_v52 = vadd.f32 %v251_v45, %v250_v44  ;;  %v273_v53 = vrot.slane %v1109_v10, %v1114_v12  ;;  %v277_v54 = vrot.slane %v1109_v10, %v1116_v13  ;;  %v281_v55 = vrot.slane %v1109_v10, %v1118_v14  ;;  %v1180_v44 = vld [vmem:[%s1134_s30] sm:$0xcc] }
  0x1a   : > { %v388_v56 = vmul.f32 %v375_v48, %v347_v40  ;;  %v389_v57 = vmul.f32 %v379_v49, %v348_v41  ;;  %v390_v58 = vmul.f32 %v383_v50, %v349_v42  ;;  %v391_v59 = vmul.f32 %v387_v51, %v350_v43 }
  0x1b   : > { %v255_v60 = vadd.f32 %v254_v52, %v252_v46  ;;  %v285_v61 = vrot.slane %v1109_v10, %v1120_v15  ;;  %v293_v62 = vrot.slane %v273_v53, %v1114_v12  ;;  %v297_v63 = vrot.slane %v277_v54, %v1114_v12 }
  0x1c   : > { %v397_v1 = vsel %vm396_vm0, %v388_v56, 0.0  ;;  %v398_v2 = vsel %vm396_vm0, %v389_v57, 0.0  ;;  %v400_v3 = vsel %vm396_vm0, %v390_v58, 0.0  ;;  %v402_v4 = vsel %vm396_vm0, %v391_v59, 0.0  ;;  %v426_v58 = vld [vmem:[%s1134_s30 + $0x10] sm:$0x33] }
  0x1d   : > { %v256_v6 = vadd.f32 %v255_v60, %v253_v47  ;;  %v399_v8 = vadd.f32 %v398_v2, %v397_v1  ;;  %v301_v9 = vrot.slane %v281_v55, %v1114_v12  ;;  %v305_v10 = vrot.slane %v285_v61, %v1114_v12 }
  0x1e   : > { %v306_v20 = vmul.f32 %v293_v62, %v209_v31  ;;  %v307_v21 = vmul.f32 %v297_v63, %v210_v32  ;;  %v265_v22 = vunpack.c.l.bf16 %v260_v0  ;;  %v266_v23 = vunpack.c.h.bf16 %v260_v0 }
  0x1f   : > { %257 = vadd.xlane.f32.xlu0 %v256_v6  ;;  %v401_v24 = vadd.f32 %v400_v3, %v399_v8  ;;  %v308_v25 = vmul.f32 %v301_v9, %v211_v33  ;;  %v309_v26 = vmul.f32 %v305_v10, %v212_v34  ;;  %v267_v27 = vunpack.c.l.bf16 %v261_v5  ;;  %v427_v3 = vld [vmem:[%s1134_s30 + $0x18] sm:$0x33] }
  0x20   : > { %v315_v28 = vsel %vm314_vm1, %v306_v20, 0.0  ;;  %v316_v29 = vsel %vm314_vm1, %v307_v21, 0.0  ;;  %v268_v30 = vunpack.c.h.bf16 %v261_v5  ;;  %v392_v35 = vmul.f32 %v375_v48, %v265_v22 }
  0x21   : > { %v403_v36 = vadd.f32 %v402_v4, %v401_v24  ;;  %v317_v37 = vadd.f32 %v316_v29, %v315_v28  ;;  %v318_v38 = vsel %vm314_vm1, %v308_v25, 0.0  ;;  %v320_v31 = vsel %vm314_vm1, %v309_v26, 0.0 }
  0x22   : > { %v393_v32 = vmul.f32 %v379_v49, %v266_v23  ;;  %v394_v39 = vmul.f32 %v383_v50, %v267_v27  ;;  %v395_v40 = vmul.f32 %v387_v51, %v268_v30  ;;  %v407_v33 = vsel %vm406_vm2, %v392_v35, 0.0  ;;  %v1186_v49 = vld [vmem:[%s1134_s30 + $0x8] sm:$0xcc] }
  0x23   : > { %404 = vadd.xlane.f32.xlu1 %v403_v36  ;;  %v319_v34 = vadd.f32 %v318_v38, %v317_v37  ;;  %v310_v41 = vmul.f32 %v293_v62, %v265_v22  ;;  %v311_v42 = vmul.f32 %v297_v63, %v266_v23  ;;  %v312_v43 = vmul.f32 %v301_v9, %v267_v27 }
  0x24   : > { %vm494_vm5 = vcmask 1043456   ;;  %v408_v45 = vsel %vm406_vm2, %v393_v32, 0.0  ;;  %v410_v46 = vsel %vm406_vm2, %v394_v39, 0.0  ;;  %v412_v47 = vsel %vm406_vm2, %v395_v40, 0.0  ;;  %v1217_v39 = vld [vmem:[%s1134_s30 + $0x10] sm:$0x77] }
  0x25   : > { %v313_v48 = vmul.f32 %v305_v10, %v268_v30  ;;  %v321_v50 = vadd.f32 %v320_v31, %v319_v34  ;;  %v409_v51 = vadd.f32 %v408_v45, %v407_v33  ;;  %v325_v52 = vsel %vm324_vm3, %v310_v41, 0.0 }
  0x26   : > { %v326_v53 = vsel %vm324_vm3, %v311_v42, 0.0  ;;  %v328_v55 = vsel %vm324_vm3, %v312_v43, 0.0  ;;  %v431_v57 = vunpack.c.l.bf16 %v1180_v44  ;;  %v432_v60 = vunpack.c.h.bf16 %v1180_v44 }
  0x27   : > { %v327_v54 = vadd.f32 %v326_v53, %v325_v52  ;;  %v330_v56 = vsel %vm324_vm3, %v313_v48, 0.0  ;;  %322 = vadd.xlane.f32.xlu0 %v321_v50  ;;  %v411_v59 = vadd.f32 %v410_v46, %v409_v51  ;;  %v433_v61 = vunpack.c.l.bf16 %v1186_v49  ;;  %v1228_v46 = vld [vmem:[%s1134_s30 + $0x18] sm:$0x77] }
  0x28   : > { %v434_v62 = vunpack.c.h.bf16 %v1186_v49  ;;  %v443_v0 = vrot.slane %v1111_v11, %v1114_v12  ;;  %v447_v1 = vrot.slane %v1111_v11, %v1116_v13  ;;  %v451_v2 = vrot.slane %v1111_v11, %v1118_v14 }
  0x29   : > { %v329_v63 = vadd.f32 %v328_v55, %v327_v54  ;;  %v413_v4 = vadd.f32 %v412_v47, %v411_v59  ;;  %v455_v5 = vrot.slane %v1111_v11, %v1120_v15  ;;  %v435_v6 = vunpack.c.l.bf16 %v426_v58 }
  0x2a   : > { %v436_v8 = vunpack.c.h.bf16 %v426_v58  ;;  %v463_v10 = vrot.slane %v443_v0, %v1114_v12  ;;  %v467_v20 = vrot.slane %v447_v1, %v1114_v12  ;;  %v471_v21 = vrot.slane %v451_v2, %v1114_v12 }
  0x2b   : > { %v331_v9 = vadd.f32 %v330_v56, %v329_v63  ;;  %vm565_vm6 = vcmask 1047557   ;;  %414 = vadd.xlane.f32.xlu1 %v413_v4  ;;  %v475_v22 = vrot.slane %v455_v5, %v1114_v12  ;;  %v437_v23 = vunpack.c.l.bf16 %v427_v3 }
  0x2c   : > { %v438_v24 = vunpack.c.h.bf16 %v427_v3  ;;  %v524_v25 = vrot.slane %v1122_v16, %v1114_v12  ;;  %v476_v11 = vmul.f32 %v463_v10, %v431_v57  ;;  %v477_v26 = vmul.f32 %v467_v20, %v432_v60 }
  0x2d   : > { %332 = vadd.xlane.f32.xlu0 %v331_v9  ;;  %v478_v27 = vmul.f32 %v471_v21, %v433_v61  ;;  %v480_v28 = vmul.f32 %v463_v10, %v435_v6  ;;  %vm575_vm7 = vcmask 1044480   ;;  %v479_v29 = vmul.f32 %v475_v22, %v434_v62  ;;  %v593_v6 = vld [vmem:[%s1134_s30] sm:$0x88] }
  0x2e   : > { %v481_v30 = vmul.f32 %v467_v20, %v436_v8  ;;  %v482_v35 = vmul.f32 %v471_v21, %v437_v23  ;;  %v483_v36 = vmul.f32 %v475_v22, %v438_v24  ;;  %v485_v37 = vsel %vm484_vm4, %v476_v11, 0.0  ;;  %v1251_v11 = vld [vmem:[%s1134_s30 + $0x10] sm:$0xff] }
  0x2f   : > { %v486_v38 = vsel %vm484_vm4, %v477_v26, 0.0  ;;  %v488_v31 = vsel %vm484_vm4, %v478_v27, 0.0  ;;  %v495_v32 = vsel %vm494_vm5, %v480_v28, 0.0  ;;  %v490_v33 = vsel %vm484_vm4, %v479_v29, 0.0 }
  0x30   : > { %v487_v40 = vadd.f32 %v486_v38, %v485_v37  ;;  %v496_v34 = vsel %vm494_vm5, %v481_v30, 0.0  ;;  %v498_v41 = vsel %vm494_vm5, %v482_v35, 0.0  ;;  %v500_v43 = vsel %vm494_vm5, %v483_v36, 0.0  ;;  %v1260_v38 = vld [vmem:[%s1134_s30 + $0x18] sm:$0xff] }
  0x31   : > { %v497_v42 = vadd.f32 %v496_v34, %v495_v32  ;;  %v528_v44 = vrot.slane %v1122_v16, %v1116_v13  ;;  %v532_v45 = vrot.slane %v1122_v16, %v1118_v14  ;;  %v536_v48 = vrot.slane %v1122_v16, %v1120_v15 }
  0x32   : > { %v489_v47 = vadd.f32 %v488_v31, %v487_v40  ;;  %v544_v49 = vrot.slane %v524_v25, %v1114_v12  ;;  %v516_v50 = vunpack.c.l.bf16 %v1217_v39  ;;  %v517_v54 = vunpack.c.h.bf16 %v1217_v39 }
  0x33   : > { %v499_v51 = vadd.f32 %v498_v41, %v497_v42  ;;  %v548_v52 = vrot.slane %v528_v44, %v1114_v12  ;;  %v552_v53 = vrot.slane %v532_v45, %v1114_v12  ;;  %v556_v56 = vrot.slane %v536_v48, %v1114_v12 }
  0x34   : > { %v491_v55 = vadd.f32 %v490_v33, %v489_v47  ;;  %v557_v58 = vmul.f32 %v544_v49, %v431_v57  ;;  %v518_v59 = vunpack.c.l.bf16 %v1228_v46  ;;  %v519_v1 = vunpack.c.h.bf16 %v1228_v46 }
  0x35   : > { %v501_v63 = vadd.f32 %v500_v43, %v499_v51  ;;  %v558_v16 = vmul.f32 %v548_v52, %v432_v60  ;;  %v559_v0 = vmul.f32 %v552_v53, %v433_v61  ;;  %v560_v2 = vmul.f32 %v556_v56, %v434_v62  ;;  %v594_v61 = vld [vmem:[%s1134_s30 + $0x8] sm:$0x88] }
  0x36   : > { %492 = vadd.xlane.f32.xlu1 %v491_v55  ;;  %v566_v3 = vsel %vm565_vm6, %v557_v58, 0.0  ;;  %v561_v4 = vmul.f32 %v544_v49, %v516_v50  ;;  %v562_v5 = vmul.f32 %v548_v52, %v517_v54  ;;  %vm647_vm8 = vcmask 1047558  }
  0x37   : > { %vm418_vm9 = vcmask 1045504   ;;  %502 = vadd.xlane.f32.xlu0 %v501_v63  ;;  %v567_v57 = vsel %vm565_vm6, %v558_v16, 0.0  ;;  %v569_v8 = vsel %vm565_vm6, %v559_v0, 0.0  ;;  %v563_v60 = vmul.f32 %v552_v53, %v518_v59  ;;  %v1279_v0 = vld [vmem:[%s1134_s30 + $0x20] sm:$0x11] }
  0x38   : > { %v564_v9 = vmul.f32 %v556_v56, %v519_v1  ;;  %v568_v10 = vadd.f32 %v567_v57, %v566_v3  ;;  %v571_v20 = vsel %vm565_vm6, %v560_v2, 0.0  ;;  %v576_v62 = vsel %vm575_vm7, %v561_v4, 0.0 }
  0x39   : > { %v577_v21 = vsel %vm575_vm7, %v562_v5, 0.0  ;;  %v579_v23 = vsel %vm575_vm7, %v563_v60, 0.0  ;;  %v598_v25 = vunpack.c.l.bf16 %v593_v6  ;;  %v599_v27 = vunpack.c.h.bf16 %v593_v6  ;;  %v1290_v6 = vld [vmem:[%s1134_s30 + $0x28] sm:$0x11] }
  0x3a   : > { %v578_v22 = vadd.f32 %v577_v21, %v576_v62  ;;  %v581_v24 = vsel %vm575_vm7, %v564_v9, 0.0  ;;  %v570_v26 = vadd.f32 %v569_v8, %v568_v10  ;;  %v600_v28 = vunpack.c.l.bf16 %v594_v61 }
  0x3b   : > { %v601_v29 = vunpack.c.h.bf16 %v594_v61  ;;  %v606_v35 = vrot.slane %v1124_v17, %v1114_v12  ;;  %v610_v36 = vrot.slane %v1124_v17, %v1116_v13  ;;  %v614_v37 = vrot.slane %v1124_v17, %v1118_v14 }
  0x3c   : > { %v580_v30 = vadd.f32 %v579_v23, %v578_v22  ;;  %v572_v31 = vadd.f32 %v571_v20, %v570_v26  ;;  %v618_v32 = vrot.slane %v1124_v17, %v1120_v15  ;;  %v678_v39 = vunpack.c.l.bf16 %v1251_v11 }
  0x3d   : > { %v679_v40 = vunpack.c.h.bf16 %v1251_v11  ;;  %v626_v34 = vrot.slane %v606_v35, %v1114_v12  ;;  %v630_v41 = vrot.slane %v610_v36, %v1114_v12  ;;  %v634_v42 = vrot.slane %v614_v37, %v1114_v12 }
  0x3e   : > { %v582_v33 = vadd.f32 %v581_v24, %v580_v30  ;;  %573 = vadd.xlane.f32.xlu1 %v572_v31  ;;  %v638_v43 = vrot.slane %v618_v32, %v1114_v12  ;;  %v680_v44 = vunpack.c.l.bf16 %v1260_v38  ;;  %v681_v45 = vunpack.c.h.bf16 %v1260_v38 }
  0x3f   : > { %v742_v17 = vrot.slane %v1127_v18, %v1114_v12  ;;  %v639_v46 = vmul.f32 %v626_v34, %v598_v25  ;;  %v640_v47 = vmul.f32 %v630_v41, %v599_v27  ;;  %v641_v48 = vmul.f32 %v634_v42, %v600_v28 }
  0x40   : > { %583 = vadd.xlane.f32.xlu0 %v582_v33  ;;  %v643_v49 = vmul.f32 %v626_v34, %v516_v50  ;;  %v642_v51 = vmul.f32 %v638_v43, %v601_v29  ;;  %v644_v52 = vmul.f32 %v630_v41, %v517_v54  ;;  %v645_v53 = vmul.f32 %v634_v42, %v518_v59 }
  0x41   : > { %v646_v55 = vmul.f32 %v638_v43, %v519_v1  ;;  %v648_v56 = vsel %vm647_vm8, %v639_v46, 0.0  ;;  %v649_v58 = vsel %vm647_vm8, %v640_v47, 0.0  ;;  %v651_v63 = vsel %vm647_vm8, %v641_v48, 0.0  ;;  %v808_v43 = vld [vmem:[%s1134_s30 + $0x10] sm:$0xee] }
  0x42   : > { %v657_v16 = vsel %vm418_vm9, %v643_v49, 0.0  ;;  %v650_v2 = vadd.f32 %v649_v58, %v648_v56  ;;  %v653_v3 = vsel %vm647_vm8, %v642_v51, 0.0  ;;  %v658_v50 = vsel %vm418_vm9, %v644_v52, 0.0 }
  0x43   : > { %v660_v54 = vsel %vm418_vm9, %v645_v53, 0.0  ;;  %v659_v4 = vadd.f32 %v658_v50, %v657_v16  ;;  %v662_v59 = vsel %vm418_vm9, %v646_v55, 0.0  ;;  %v746_v1 = vrot.slane %v1127_v18, %v1116_v13 }
  0x44   : > { %v750_v5 = vrot.slane %v1127_v18, %v1118_v14  ;;  %v652_v57 = vadd.f32 %v651_v63, %v650_v2  ;;  %v754_v8 = vrot.slane %v1127_v18, %v1120_v15  ;;  %v762_v60 = vrot.slane %v742_v17, %v1114_v12 }
  0x45   : > { %v734_v9 = vunpack.c.l.bf16 %v1279_v0  ;;  %v661_v61 = vadd.f32 %v660_v54, %v659_v4  ;;  %v766_v10 = vrot.slane %v746_v1, %v1114_v12  ;;  %v735_v62 = vunpack.c.h.bf16 %v1279_v0  ;;  %v809_v1 = vld [vmem:[%s1134_s30 + $0x18] sm:$0xee] }
  0x46   : > { %v770_v20 = vrot.slane %v750_v5, %v1114_v12  ;;  %v654_v21 = vadd.f32 %v653_v3, %v652_v57  ;;  %v774_v22 = vrot.slane %v754_v8, %v1114_v12  ;;  %v775_v23 = vmul.f32 %v762_v60, %v678_v39 }
  0x47   : > { %v736_v24 = vunpack.c.l.bf16 %v1290_v6  ;;  %v663_v18 = vadd.f32 %v662_v59, %v661_v61  ;;  %v776_v25 = vmul.f32 %v766_v10, %v679_v40  ;;  %v737_v27 = vunpack.c.h.bf16 %v1290_v6 }
  0x48   : > { %v777_v26 = vmul.f32 %v770_v20, %v680_v44  ;;  %655 = vadd.xlane.f32.xlu1 %v654_v21  ;;  %v778_v28 = vmul.f32 %v774_v22, %v681_v45  ;;  %v783_v29 = vsel %vm314_vm1, %v775_v23, 0.0  ;;  %v779_v30 = vmul.f32 %v762_v60, %v734_v9 }
  0x49   : > { %v780_v35 = vmul.f32 %v766_v10, %v735_v62  ;;  %664 = vadd.xlane.f32.xlu0 %v663_v18  ;;  %v784_v36 = vsel %vm314_vm1, %v776_v25, 0.0  ;;  %v781_v31 = vmul.f32 %v770_v20, %v736_v24  ;;  %v782_v32 = vmul.f32 %v774_v22, %v737_v27 }
  0x4a   : > { %v786_v37 = vsel %vm314_vm1, %v777_v26, 0.0  ;;  %v785_v33 = vadd.f32 %v784_v36, %v783_v29  ;;  %v788_v34 = vsel %vm314_vm1, %v778_v28, 0.0  ;;  %v792_v41 = vsel %vm324_vm3, %v779_v30, 0.0 }
  0x4b   : > { %v793_v42 = vsel %vm324_vm3, %v780_v35, 0.0  ;;  %v795_v46 = vsel %vm324_vm3, %v781_v31, 0.0  ;;  %v797_v47 = vsel %vm324_vm3, %v782_v32, 0.0  ;;  %v686_v48 = vrot.slane %v1129_v19, %v1114_v12 }
  0x4c   : > { %v794_v17 = vadd.f32 %v793_v42, %v792_v41  ;;  %v787_v49 = vadd.f32 %v786_v37, %v785_v33  ;;  %v690_v51 = vrot.slane %v1129_v19, %v1116_v13  ;;  %v694_v52 = vrot.slane %v1129_v19, %v1118_v14 }
  0x4d   : > { %v698_v53 = vrot.slane %v1129_v19, %v1120_v15  ;;  %v706_v56 = vrot.slane %v686_v48, %v1114_v12  ;;  %v812_v58 = vunpack.c.h.bf16 %v1104_v7  ;;  %v813_v63 = vunpack.c.l.bf16 %v808_v43 }
  0x4e   : > { %v796_v55 = vadd.f32 %v795_v46, %v794_v17  ;;  %v789_v16 = vadd.f32 %v788_v34, %v787_v49  ;;  %v710_v2 = vrot.slane %v690_v51, %v1114_v12  ;;  %v714_v3 = vrot.slane %v694_v52, %v1114_v12 }
  0x4f   : > { %v718_v50 = vrot.slane %v698_v53, %v1114_v12  ;;  %v719_v4 = vmul.f32 %v706_v56, %v678_v39  ;;  %v821_v59 = vrot.slane %v812_v58, %v1114_v12  ;;  %v825_v19 = vrot.slane %v812_v58, %v1116_v13 }
  0x50   : > { %v798_v54 = vadd.f32 %v797_v47, %v796_v55  ;;  %790 = vadd.xlane.f32.xlu1 %v789_v16  ;;  %v720_v7 = vmul.f32 %v710_v2, %v679_v40  ;;  %v721_v5 = vmul.f32 %v714_v3, %v680_v44  ;;  %v829_v57 = vrot.slane %v812_v58, %v1118_v14 }
  0x51   : > { %v722_v6 = vmul.f32 %v718_v50, %v681_v45  ;;  %v833_v39 = vrot.slane %v812_v58, %v1120_v15  ;;  %v841_v8 = vrot.slane %v821_v59, %v1114_v12  ;;  %v845_v13 = vrot.slane %v825_v19, %v1114_v12 }
  0x52   : > { %799 = vadd.xlane.f32.xlu0 %v798_v54  ;;  %v814_v60 = vunpack.c.h.bf16 %v808_v43  ;;  %v723_v61 = vadd.f32 %v720_v7, %v719_v4  ;;  %v849_v11 = vrot.slane %v829_v57, %v1114_v12  ;;  %v815_v40 = vunpack.c.l.bf16 %v809_v1 }
  0x53   : > { %v816_v10 = vunpack.c.h.bf16 %v809_v1  ;;  %v853_v44 = vrot.slane %v833_v39, %v1114_v12  ;;  %v858_v38 = vmul.f32 %v841_v8, %v734_v9  ;;  %v859_v45 = vmul.f32 %v845_v13, %v735_v62 }
  0x54   : > { %v854_v14 = vmul.f32 %v841_v8, %v813_v63  ;;  %v724_v20 = vadd.f32 %v723_v61, %v721_v5  ;;  %v860_v21 = vmul.f32 %v849_v11, %v736_v24  ;;  %v855_v15 = vmul.f32 %v845_v13, %v814_v60 }
  0x55   : > { %v856_v22 = vmul.f32 %v849_v11, %v815_v40  ;;  %v861_v23 = vmul.f32 %v853_v44, %v737_v27  ;;  %v871_v18 = vsel %vm406_vm2, %v858_v38, 0.0  ;;  %v872_v25 = vsel %vm406_vm2, %v859_v45, 0.0 }
  0x56   : > { %v857_v26 = vmul.f32 %v853_v44, %v816_v10  ;;  %v725_v28 = vadd.f32 %v724_v20, %v722_v6  ;;  %v873_v29 = vadd.f32 %v872_v25, %v871_v18  ;;  %v874_v30 = vsel %vm406_vm2, %v860_v21, 0.0  ;;  %v997_v20 = vld [vmem:[#allocation2] ss:$0 sm:$0xff] }
  0x57   : > { %v862_v12 = vsel %vm396_vm0, %v854_v14, 0.0  ;;  %v876_v0 = vsel %vm406_vm2, %v861_v23, 0.0  ;;  %v863_v9 = vsel %vm396_vm0, %v855_v15, 0.0  ;;  %v865_v62 = vsel %vm396_vm0, %v856_v22, 0.0 }
  0x58   : > { %726 = vadd.xlane.f32.xlu1 %v725_v28  ;;  %v875_v24 = vadd.f32 %v874_v30, %v873_v29  ;;  %v864_v27 = vadd.f32 %v863_v9, %v862_v12  ;;  %v867_v35 = vsel %vm396_vm0, %v857_v26, 0.0  ;;  %vm336_vm10 = vcmask 1046528  }
  0x59   : > { %vm587_vm11 = vcmask 1042432   ;;  %vm895_vm12 = vcmask 7168  }
  0x5a   : > { %v877_v36 = vadd.f32 %v876_v0, %v875_v24  ;;  %v866_v37 = vadd.f32 %v865_v62, %v864_v27 }
  0x5c   : > { %878 = vadd.xlane.f32.xlu1 %v877_v36  ;;  %v868_v31 = vadd.f32 %v867_v35, %v866_v37 }
  0x5e   : > { %869 = vadd.xlane.f32.xlu0 %v868_v31 }
  0xa8   : > { %v258_v32 = vpop.xlane.xlu0 %257 }
  0xac   : > { %v405_v33 = vpop.xlane.xlu1 %404 }
  0xad   : > { %v419_v56 = vrot.slane %v405_v33, 2 }
  0xb0   : > { %v323_v34 = vpop.xlane.xlu0 %322 }
  0xb1   : > { %v337_v48 = vrot.slane %v323_v34, 1 }
  0xb4   : > { %v415_v41 = vpop.xlane.xlu1 %414 }
  0xb5   : > { %v420_v52 = vrot.slane %v415_v41, 2 }
  0xb6   : > { %v333_v42 = vpop.xlane.xlu0 %332 }
  0xb7   : > { %v338_v46 = vrot.slane %v333_v42, 1  ;;  %v421_v16 = vsel %vm418_vm9, %v419_v56, %v420_v52 }
  0xb9   : > { %v339_v51 = vsel %vm336_vm10, %v337_v48, %v338_v46 }
  0xba   : > { %v341_v53 = vadd.f32 %v339_v51, %v258_v32 }
  0xbc   : > { %v423_v50 = vadd.f32 %v421_v16, %v341_v53 }
  0xbf   : > { %v493_v43 = vpop.xlane.xlu1 %492 }
  0xc0   : > { %v503_v17 = vpop.xlane.xlu0 %502  ;;  %v506_v2 = vrot.slane %v493_v43, 4 }
  0xc1   : > { %v507_v58 = vrot.slane %v503_v17, 4 }
  0xc3   : > { %v508_v54 = vsel %vm494_vm5, %v506_v2, %v507_v58 }
  0xc4   : > { %v510_v5 = vadd.f32 %v508_v54, %v423_v50 }
  0xc7   : > { %v574_v47 = vpop.xlane.xlu1 %573 }
  0xc8   : > { %v588_v4 = vrot.slane %v574_v47, 5 }
  0xc9   : > { %v584_v49 = vpop.xlane.xlu0 %583 }
  0xca   : > { %v589_v3 = vrot.slane %v584_v49, 5 }
  0xcc   : > { %v590_v1 = vsel %vm587_vm11, %v588_v4, %v589_v3 }
  0xcd   : > { %v592_v39 = vadd.f32 %v590_v1, %v510_v5 }
  0xd1   : > { %v656_v55 = vpop.xlane.xlu1 %655 }
  0xd2   : > { %v665_v63 = vpop.xlane.xlu0 %664  ;;  %v668_v7 = vrot.slane %v656_v55, 6 }
  0xd3   : > { %v669_v59 = vrot.slane %v665_v63, 6 }
  0xd5   : > { %v670_v6 = vsel %vm406_vm2, %v668_v7, %v669_v59 }
  0xd6   : > { %v672_v13 = vadd.f32 %v670_v6, %v592_v39 }
  0xd9   : > { %v791_v19 = vpop.xlane.xlu1 %790 }
  0xda   : > { %v803_v61 = vrot.slane %v791_v19, 1 }
  0xdb   : > { %v800_v57 = vpop.xlane.xlu0 %799 }
  0xdc   : > { %v804_v60 = vrot.slane %v800_v57, 1 }
  0xde   : > { %v805_v10 = vsel %vm336_vm10, %v803_v61, %v804_v60 }
  0xe1   : > { %v727_v8 = vpop.xlane.xlu1 %726 }
  0xe2   : > { %v728_v11 = vadd.f32 %v727_v8, %v672_v13 }
  0xe4   : > { %v807_v14 = vadd.f32 %v805_v10, %v728_v11 }
  0xe5   : > { %v879_v40 = vpop.xlane.xlu1 %878 }
  0xe6   : > { %v883_v44 = vrot.slane %v879_v40, 2 }
  0xe7   : > { %v870_v38 = vpop.xlane.xlu0 %869 }
  0xe8   : > { %v882_v45 = vrot.slane %v870_v38, 2 }
  0xea   : > { %v884_v21 = vsel %vm418_vm9, %v882_v45, %v883_v44 }
  0xeb   : > { %v886_v15 = vadd.f32 %v884_v21, %v807_v14 }
  0xed   : > { %v894_v22 = vadd.f32 %v997_v20, %v886_v15 }
  0xef   : > { %896 = vst.msk [vmem:[%s204_s7] sm:$0xff] %vm895_vm12, %v894_v22 }
  0xf0 PF: > { %s15_s16 = sadd.s32 1, %s1047_s16   ;;  %s1384_s14 = smov %s1043_s15 }
  0xf1   : > { %p12_p5 = scmp.ge.s32.totalorder %s15_s16, 4   ;;  %s1385_s15 = smov %s1387_s2 }
  0xf3   :  { %14 = sbr.rel (!%p12_p5) target bundleno = 3 (0x3), region = 73 }

</bundles_post_ra>
